<compile_context>
chip_gen: v7x
topology: tpu7x:2x2x1
jax: 0.10.0
libtpu: 0.0.40
codegen_flags: <defaults>
</compile_context>

<pallas_src>
import functools

import jax
import jax.numpy as jnp
from jax.experimental import pallas as pl
from jax.experimental.pallas import tpu as pltpu

EPS = 1e-5
LEAKY_SLOPE = 0.1
LANE = 128


def _leaky(x):
    return jnp.where(x >= 0, x, LEAKY_SLOPE * x)


def _round_up(v, m):
    return (v + m - 1) // m * m


def _pick_row_tile(N, H, Wo, Cinp, Chp, Coutp,
                   budget_bytes=30 * 1024 * 1024, max_tile_elems=4096):
    """Largest divisor of H whose in-kernel working set fits the VMEM budget."""
    def est(th):
        blocks = 2 * ((th + 2) * Wo * Cinp * 4 + th * Wo * Coutp * 4)  # dbl-buffered I/O
        x_all = (th + 2) * Wo * Cinp * 2                               # bf16 concat
        y1 = (th + 2) * Wo * Chp * 4                                   # f32 cv1 out
        y1p = (th + 2) * (Wo + 2) * Chp * 2                            # bf16 padded
        patch = th * Wo * 9 * Chp * 2                                  # bf16 im2col
        y2 = th * Wo * Coutp * 4                                       # f32 cv2 out
        w = 2 * (Cinp * Chp * 2 + 9 * Chp * Coutp * 2 + (Chp + Coutp) * 4)
        return blocks + x_all + y1 + y1p + patch + y2 + w

    fitting = [t for t in range(1, H + 1)
               if H % t == 0 and est(t) <= budget_bytes and t * Wo <= max_tile_elems]
    th = max(fitting) if fitting else 1
    # Keep at least 2 grid steps so both v7x TensorCores get work.
    if N * (H // th) < 2:
        smaller = [t for t in fitting if H // t >= 2]
        if smaller:
            th = max(smaller)
    return th, est(th)


def make_bottleneck_kernel(TH, W, Wo, Cinp, Chp, Coutp, add):
    def kernel(xc_ref, xt_ref, xb_ref, w1_ref, b1_ref, w2_ref, b2_ref, out_ref):
        i = pl.program_id(1)
        last = pl.num_programs(1) - 1

        xc_f32 = xc_ref[0]                                     # (TH, Wo, Cinp) f32
        # Cast to bf16 *before* concatenating so the only full-tile copy of the
        # (TH+2)-row window is half-width.
        x_all = jnp.concatenate(
            [xt_ref[0].astype(jnp.bfloat16),
             xc_f32.astype(jnp.bfloat16),
             xb_ref[0].astype(jnp.bfloat16)], axis=0)          # (TH+2, Wo, Cinp) bf16

        # ---- cv1: 1x1 conv (BN folded into w1/b1) + LeakyReLU ----
        y1 = jnp.dot(x_all.reshape((TH + 2) * Wo, Cinp), w1_ref[...],
                     preferred_element_type=jnp.float32)
        y1 = _leaky(y1 + b1_ref[...])                          # ((TH+2)*Wo, Chp) f32

        # Positions that must act as cv2's zero padding: halo rows at the image
        # top/bottom (their index_map clamps to valid rows) and any W-alignment
        # padding columns.  One in-vreg broadcast multiply — no concat copies.
        r = jax.lax.broadcasted_iota(jnp.int32, ((TH + 2) * Wo, 1), 0)
        keep = jnp.logical_and(
            jnp.logical_or(r >= Wo, i > 0),                    # top halo row
            jnp.logical_or(r < (TH + 1) * Wo, i < last))       # bottom halo row
        if Wo != W:
            keep = jnp.logical_and(keep, (r % Wo) < W)         # W-pad columns
        y1 = (y1 * keep.astype(jnp.float32)).astype(jnp.bfloat16)
        y1 = y1.reshape(TH + 2, Wo, Chp)

        # Lateral zero padding of the 3x3 conv, done once and in bf16.
        zcol = jnp.zeros((TH + 2, 1, Chp), jnp.bfloat16)
        y1p = jnp.concatenate([zcol, y1, zcol], axis=1)        # (TH+2, Wo+2, Chp)

        # ---- cv2: 3x3 conv as a single im2col matmul, K = 9*Chp ----
        # TODO(synk): on v5e (128x128 MXU) prefer 3 accumulating K=3*Chp dots
        # into an f32 scratch to avoid materializing this 9x-wide patch.
        patch = jnp.concatenate(
            [y1p[ky:ky + TH, kx:kx + Wo, :] for ky in range(3) for kx in range(3)],
            axis=-1).reshape(TH * Wo, 9 * Chp)
        y2 = jnp.dot(patch, w2_ref[...], preferred_element_type=jnp.float32)
        y2 = _leaky(y2 + b2_ref[...]).reshape(TH, Wo, Coutp)

        if add:
            y2 = y2 + xc_f32                                   # residual in f32
        out_ref[0] = y2.astype(out_ref.dtype)

    return kernel


@functools.partial(jax.jit, static_argnames=("shortcut",))
def bottleneck_forward(x_nchw, params, *, shortcut=True):
    """x_nchw: (N, Cin, H, W) float32.  Returns (N, Cout, H, W) float32."""
    N, Cin, H, W = x_nchw.shape
    Cout, Ch = params["w2"].shape[0], params["w2"].shape[1]
    add = bool(shortcut and Cin == Cout)

    Cinp, Chp, Coutp = (_round_up(c, LANE) for c in (Cin, Ch, Cout))
    Wo = _round_up(W, 8)                       # sublane-aligned width
    TH, vmem_est = _pick_row_tile(N, H, Wo, Cinp, Chp, Coutp)
    n_tiles = H // TH

    # ---- host-side prep: BN folding + lane-dense (128-padded) layouts ----
    s1 = params["g1"] * jax.lax.rsqrt(params["v1"] + EPS)
    s2 = params["g2"] * jax.lax.rsqrt(params["v2"] + EPS)
    b1 = params["b1"] - params["m1"] * s1
    b2 = params["b2"] - params["m2"] * s2

    w1 = params["w1"][:, :, 0, 0].T * s1[None, :]                  # (Cin, Ch)
    w2 = jnp.transpose(params["w2"] * s2[:, None, None, None],     # fold BN2
                       (2, 3, 1, 0))                               # (3,3,Ch,Cout)

    w1p = jnp.zeros((Cinp, Chp), jnp.float32).at[:Cin, :Ch].set(w1)
    w2p = jnp.zeros((3, 3, Chp, Coutp), jnp.float32).at[:, :, :Ch, :Cout].set(w2)
    w1p = w1p.astype(jnp.bfloat16)
    w2p = w2p.reshape(9 * Chp, Coutp).astype(jnp.bfloat16)
    b1p = jnp.zeros((1, Chp), jnp.float32).at[0, :Ch].set(b1)
    b2p = jnp.zeros((1, Coutp), jnp.float32).at[0, :Cout].set(b2)

    # NCHW -> NHWC, W padded to a multiple of 8 and channels to 128 lanes.
    # TODO(synk): keep NHWC + 128-padded channels (and bf16 activations) end to
    # end across the model so these layout passes are not a per-layer HBM trip.
    x_nhwc = jnp.pad(jnp.transpose(x_nchw, (0, 2, 3, 1)),
                     ((0, 0), (0, 0), (0, Wo - W), (0, Cinp - Cin)))

    kernel = make_bottleneck_kernel(TH, W, Wo, Cinp, Chp, Coutp, add)

    # VMEM limit = working-set estimate + headroom, clamped inside v7x's 64 MiB.
    vmem_limit = int(min(max(vmem_est * 3 // 2, 32 * 1024 * 1024),
                         48 * 1024 * 1024))

    out_nhwc = pl.pallas_call(
        kernel,
        out_shape=jax.ShapeDtypeStruct((N, H, Wo, Coutp), jnp.float32),
        grid=(N, n_tiles),
        in_specs=[
            # centre rows [i*TH, i*TH + TH)
            pl.BlockSpec((1, TH, Wo, Cinp), lambda n, i: (n, i, 0, 0)),
            # 1-row top / bottom halo (index clamped at the image border; the
            # kernel zeroes them there so cv2 sees the conv's zero padding)
            pl.BlockSpec((1, 1, Wo, Cinp),
                         lambda n, i: (n, jnp.maximum(i * TH - 1, 0), 0, 0)),
            pl.BlockSpec((1, 1, Wo, Cinp),
                         lambda n, i: (n, jnp.minimum(i * TH + TH, H - 1), 0, 0)),
            # Weights/biases: constant index_map => fetched once.  (On v7x with
            # 512-channel layers, pipeline_mode=pl.Buffered(1) here would also
            # drop their second VMEM buffer.)
            pl.BlockSpec((Cinp, Chp), lambda n, i: (0, 0)),
            pl.BlockSpec((1, Chp), lambda n, i: (0, 0)),
            pl.BlockSpec((9 * Chp, Coutp), lambda n, i: (0, 0)),
            pl.BlockSpec((1, Coutp), lambda n, i: (0, 0)),
        ],
        out_specs=pl.BlockSpec((1, TH, Wo, Coutp), lambda n, i: (n, i, 0, 0)),
        compiler_params=pltpu.CompilerParams(
            dimension_semantics=("parallel", "parallel"),
            vmem_limit_bytes=vmem_limit),
    )(x_nhwc, x_nhwc, x_nhwc, w1p, b1p, w2p, b2p)

    return jnp.transpose(out_nhwc[:, :, :W, :Cout], (0, 3, 1, 2))


def ref_bottleneck(x, p, *, shortcut=True):
    """Pure-JAX reference (NCHW, matching PyTorch semantics)."""
    def conv_bn_act(x, w, g, b, m, v, pad):
        y = jax.lax.conv_general_dilated(
            x, w, window_strides=(1, 1), padding=[(pad, pad), (pad, pad)],
            dimension_numbers=("NCHW", "OIHW", "NCHW"))
        y = (y - m[None, :, None, None]) * (
            g[None, :, None, None] / jnp.sqrt(v[None, :, None, None] + EPS)
        ) + b[None, :, None, None]
        return jnp.where(y >= 0, y, LEAKY_SLOPE * y)

    y = conv_bn_act(x, p["w1"], p["g1"], p["b1"], p["m1"], p["v1"], 0)
    y = conv_bn_act(y, p["w2"], p["g2"], p["b2"], p["m2"], p["v2"], 1)
    add = shortcut and x.shape[1] == y.shape[1]
    return x + y if add else y


def init_params(key, in_channel, out_channel, expansion=0.5):
    hidden = int(out_channel * expansion)
    ks = jax.random.split(key, 10)
    return {
        # conv weights in PyTorch OIHW layout
        "w1": jax.random.normal(ks[0], (hidden, in_channel, 1, 1), jnp.float32)
              / jnp.sqrt(in_channel),
        "w2": jax.random.normal(ks[1], (out_channel, hidden, 3, 3), jnp.float32)
              / jnp.sqrt(9.0 * hidden),
        # BatchNorm parameters / running stats (inference-mode)
        "g1": 1.0 + 0.1 * jax.random.normal(ks[2], (hidden,), jnp.float32),
        "b1": 0.05 * jax.random.normal(ks[3], (hidden,), jnp.float32),
        "m1": 0.1 * jax.random.normal(ks[4], (hidden,), jnp.float32),
        "v1": jax.random.uniform(ks[5], (hidden,), jnp.float32, 0.5, 1.5),
        "g2": 1.0 + 0.1 * jax.random.normal(ks[6], (out_channel,), jnp.float32),
        "b2": 0.05 * jax.random.normal(ks[7], (out_channel,), jnp.float32),
        "m2": 0.1 * jax.random.normal(ks[8], (out_channel,), jnp.float32),
        "v2": jax.random.uniform(ks[9], (out_channel,), jnp.float32, 0.5, 1.5),
    }


if __name__ == "__main__":
    key = jax.random.PRNGKey(0)
    kx, kp = jax.random.split(key)

    N, C, H, W = 2, 4, 16, 16          # in_channel == out_channel -> shortcut add
    x = jax.random.normal(kx, (N, C, H, W), jnp.float32)
    params = init_params(kp, in_channel=C, out_channel=C, expansion=0.5)

    out = jax.block_until_ready(bottleneck_forward(x, params, shortcut=True))
    ref = ref_bottleneck(x, params, shortcut=True)

    assert out.shape == ref.shape == (N, C, H, W)
    max_err = float(jnp.max(jnp.abs(out - ref)))
    # bf16 MXU inputs -> loosen tolerance vs the pure-f32 reference.
    assert jnp.allclose(out, ref, atol=5e-2, rtol=5e-2), \
        f"mismatch vs reference (max abs err {max_err})"

    print("KERNEL_OK")
</pallas_src>

<mosaic_0001>
module attributes {stable_mosaic.version = 11 : i64} {
  func.func @kernel(%arg0: i32, %arg1: i32, %arg2: memref<1x16x16x128xf32, #tpu.memory_space<vmem>>, %arg3: memref<1x1x16x128xf32, #tpu.memory_space<vmem>>, %arg4: memref<1x1x16x128xf32, #tpu.memory_space<vmem>>, %arg5: memref<128x128xbf16, #tpu.memory_space<vmem>>, %arg6: memref<1x128xf32, #tpu.memory_space<vmem>>, %arg7: memref<1152x128xbf16, #tpu.memory_space<vmem>>, %arg8: memref<1x128xf32, #tpu.memory_space<vmem>>, %arg9: memref<1x16x16x128xf32, #tpu.memory_space<vmem>>) attributes {dimension_semantics = [#tpu.dimension_semantics<parallel>, #tpu.dimension_semantics<parallel>], iteration_bounds = array<i64: 2, 1>, scalar_prefetch = 0 : i64, scratch_operands = 0 : i64, tpu.core_type = #tpu.core_type<tc>, window_params = [{transform_indices = @transform_0, window_bounds = array<i64: 1, 16, 16, 128>}, {transform_indices = @transform_1, window_bounds = array<i64: 1, 1, 16, 128>}, {transform_indices = @transform_2, window_bounds = array<i64: 1, 1, 16, 128>}, {pipeline_mode = #tpu.pipeline_mode<synchronous>, transform_indices = @transform_3, window_bounds = array<i64: 128, 128>}, {pipeline_mode = #tpu.pipeline_mode<synchronous>, transform_indices = @transform_4, window_bounds = array<i64: 1, 128>}, {pipeline_mode = #tpu.pipeline_mode<synchronous>, transform_indices = @transform_5, window_bounds = array<i64: 1152, 128>}, {pipeline_mode = #tpu.pipeline_mode<synchronous>, transform_indices = @transform_6, window_bounds = array<i64: 1, 128>}, {transform_indices = @transform_7, window_bounds = array<i64: 1, 16, 16, 128>}]} {
    %c0 = arith.constant 0 : index
    %c0_0 = arith.constant 0 : index
    %c0_1 = arith.constant 0 : index
    %c0_2 = arith.constant 0 : index
    %0 = vector.load %arg2[%c0, %c0_0, %c0_1, %c0_2] : memref<1x16x16x128xf32, #tpu.memory_space<vmem>>, vector<1x16x16x128xf32>
    %1 = vector.shape_cast %0 : vector<1x16x16x128xf32> to vector<16x16x128xf32>
    %c0_3 = arith.constant 0 : index
    %c0_4 = arith.constant 0 : index
    %c0_5 = arith.constant 0 : index
    %c0_6 = arith.constant 0 : index
    %2 = vector.load %arg3[%c0_3, %c0_4, %c0_5, %c0_6] : memref<1x1x16x128xf32, #tpu.memory_space<vmem>>, vector<1x1x16x128xf32>
    %3 = vector.shape_cast %2 : vector<1x1x16x128xf32> to vector<1x16x128xf32>
    %4 = arith.truncf %3 : vector<1x16x128xf32> to vector<1x16x128xbf16>
    %5 = arith.truncf %1 : vector<16x16x128xf32> to vector<16x16x128xbf16>
    %c0_7 = arith.constant 0 : index
    %c0_8 = arith.constant 0 : index
    %c0_9 = arith.constant 0 : index
    %c0_10 = arith.constant 0 : index
    %6 = vector.load %arg4[%c0_7, %c0_8, %c0_9, %c0_10] : memref<1x1x16x128xf32, #tpu.memory_space<vmem>>, vector<1x1x16x128xf32>
    %7 = vector.shape_cast %6 : vector<1x1x16x128xf32> to vector<1x16x128xf32>
    %8 = arith.truncf %7 : vector<1x16x128xf32> to vector<1x16x128xbf16>
    %9 = tpu.concatenate %4, %5, %8 in 0 : vector<1x16x128xbf16>, vector<16x16x128xbf16>, vector<1x16x128xbf16> -> vector<18x16x128xbf16>
    %10 = vector.shape_cast %9 : vector<18x16x128xbf16> to vector<288x128xbf16>
    %c0_11 = arith.constant 0 : index
    %c0_12 = arith.constant 0 : index
    %11 = vector.load %arg5[%c0_11, %c0_12] : memref<128x128xbf16, #tpu.memory_space<vmem>>, vector<128x128xbf16>
    %cst = arith.constant dense<0.000000e+00> : vector<288x128xf32>
    %12 = tpu.matmul %10, %11, %cst {dimension_numbers = #tpu.dot_dimension_numbers<[1], [0], [0], [1], [0, 0, 1, 1], [], []>} : vector<288x128xbf16>, vector<128x128xbf16>, vector<288x128xf32> -> vector<288x128xf32>
    %c0_13 = arith.constant 0 : index
    %c0_14 = arith.constant 0 : index
    %13 = vector.load %arg6[%c0_13, %c0_14] : memref<1x128xf32, #tpu.memory_space<vmem>>, vector<1x128xf32>
    %14 = vector.broadcast %13 : vector<1x128xf32> to vector<288x128xf32>
    %15 = arith.addf %12, %14 : vector<288x128xf32>
    %cst_15 = arith.constant 0.000000e+00 : f32
    %16 = vector.broadcast %cst_15 : f32 to vector<288x128xf32>
    %17 = arith.cmpf oge, %15, %16 : vector<288x128xf32>
    %cst_16 = arith.constant 1.000000e-01 : f32
    %18 = vector.broadcast %cst_16 : f32 to vector<288x128xf32>
    %19 = arith.mulf %18, %15 : vector<288x128xf32>
    %20 = arith.select %17, %15, %19 : vector<288x128xi1>, vector<288x128xf32>
    %21 = tpu.iota {dimensions = array<i32: 0>} : vector<288x1xi32>
    %c16_i32 = arith.constant 16 : i32
    %22 = vector.broadcast %c16_i32 : i32 to vector<288x1xi32>
    %23 = arith.cmpi sge, %21, %22 : vector<288x1xi32>
    %c0_i32 = arith.constant 0 : i32
    %24 = arith.cmpi sgt, %arg1, %c0_i32 : i32
    %25 = vector.broadcast %24 : i1 to vector<288x1xi1>
    %26 = arith.ori %23, %25 : vector<288x1xi1>
    %c272_i32 = arith.constant 272 : i32
    %27 = vector.broadcast %c272_i32 : i32 to vector<288x1xi32>
    %28 = arith.cmpi slt, %21, %27 : vector<288x1xi32>
    %c0_i32_17 = arith.constant 0 : i32
    %29 = arith.cmpi slt, %arg1, %c0_i32_17 : i32
    %30 = vector.broadcast %29 : i1 to vector<288x1xi1>
    %31 = arith.ori %28, %30 : vector<288x1xi1>
    %32 = arith.andi %26, %31 : vector<288x1xi1>
    %33 = arith.extui %32 : vector<288x1xi1> to vector<288x1xi32>
    %34 = arith.sitofp %33 : vector<288x1xi32> to vector<288x1xf32>
    %35 = vector.broadcast %34 : vector<288x1xf32> to vector<288x128xf32>
    %36 = arith.mulf %20, %35 : vector<288x128xf32>
    %37 = arith.truncf %36 : vector<288x128xf32> to vector<288x128xbf16>
    %38 = vector.shape_cast %37 : vector<288x128xbf16> to vector<18x16x128xbf16>
    %cst_18 = arith.constant 0.000000e+00 : bf16
    %39 = vector.broadcast %cst_18 : bf16 to vector<18x1x128xbf16>
    %40 = tpu.concatenate %39, %38, %39 in 1 : vector<18x1x128xbf16>, vector<18x16x128xbf16>, vector<18x1x128xbf16> -> vector<18x18x128xbf16>
    %41 = vector.extract_strided_slice %40 {offsets = [0, 0, 0], sizes = [16, 16, 128], strides = [1, 1, 1]} : vector<18x18x128xbf16> to vector<16x16x128xbf16>
    %42 = vector.extract_strided_slice %40 {offsets = [0, 1, 0], sizes = [16, 16, 128], strides = [1, 1, 1]} : vector<18x18x128xbf16> to vector<16x16x128xbf16>
    %43 = vector.extract_strided_slice %40 {offsets = [0, 2, 0], sizes = [16, 16, 128], strides = [1, 1, 1]} : vector<18x18x128xbf16> to vector<16x16x128xbf16>
    %44 = vector.extract_strided_slice %40 {offsets = [1, 0, 0], sizes = [16, 16, 128], strides = [1, 1, 1]} : vector<18x18x128xbf16> to vector<16x16x128xbf16>
    %45 = vector.extract_strided_slice %40 {offsets = [1, 1, 0], sizes = [16, 16, 128], strides = [1, 1, 1]} : vector<18x18x128xbf16> to vector<16x16x128xbf16>
    %46 = vector.extract_strided_slice %40 {offsets = [1, 2, 0], sizes = [16, 16, 128], strides = [1, 1, 1]} : vector<18x18x128xbf16> to vector<16x16x128xbf16>
    %47 = vector.extract_strided_slice %40 {offsets = [2, 0, 0], sizes = [16, 16, 128], strides = [1, 1, 1]} : vector<18x18x128xbf16> to vector<16x16x128xbf16>
    %48 = vector.extract_strided_slice %40 {offsets = [2, 1, 0], sizes = [16, 16, 128], strides = [1, 1, 1]} : vector<18x18x128xbf16> to vector<16x16x128xbf16>
    %49 = vector.extract_strided_slice %40 {offsets = [2, 2, 0], sizes = [16, 16, 128], strides = [1, 1, 1]} : vector<18x18x128xbf16> to vector<16x16x128xbf16>
    %50 = tpu.concatenate %41, %42, %43, %44, %45, %46, %47, %48, %49 in 2 : vector<16x16x128xbf16>, vector<16x16x128xbf16>, vector<16x16x128xbf16>, vector<16x16x128xbf16>, vector<16x16x128xbf16>, vector<16x16x128xbf16>, vector<16x16x128xbf16>, vector<16x16x128xbf16>, vector<16x16x128xbf16> -> vector<16x16x1152xbf16>
    %51 = vector.shape_cast %50 : vector<16x16x1152xbf16> to vector<256x1152xbf16>
    %c0_19 = arith.constant 0 : index
    %c0_20 = arith.constant 0 : index
    %52 = vector.load %arg7[%c0_19, %c0_20] : memref<1152x128xbf16, #tpu.memory_space<vmem>>, vector<1152x128xbf16>
    %cst_21 = arith.constant dense<0.000000e+00> : vector<256x128xf32>
    %53 = tpu.matmul %51, %52, %cst_21 {dimension_numbers = #tpu.dot_dimension_numbers<[1], [0], [0], [1], [0, 0, 1, 1], [], []>} : vector<256x1152xbf16>, vector<1152x128xbf16>, vector<256x128xf32> -> vector<256x128xf32>
    %c0_22 = arith.constant 0 : index
    %c0_23 = arith.constant 0 : index
    %54 = vector.load %arg8[%c0_22, %c0_23] : memref<1x128xf32, #tpu.memory_space<vmem>>, vector<1x128xf32>
    %55 = vector.broadcast %54 : vector<1x128xf32> to vector<256x128xf32>
    %56 = arith.addf %53, %55 : vector<256x128xf32>
    %cst_24 = arith.constant 0.000000e+00 : f32
    %57 = vector.broadcast %cst_24 : f32 to vector<256x128xf32>
    %58 = arith.cmpf oge, %56, %57 : vector<256x128xf32>
    %cst_25 = arith.constant 1.000000e-01 : f32
    %59 = vector.broadcast %cst_25 : f32 to vector<256x128xf32>
    %60 = arith.mulf %59, %56 : vector<256x128xf32>
    %61 = arith.select %58, %56, %60 : vector<256x128xi1>, vector<256x128xf32>
    %62 = vector.shape_cast %61 : vector<256x128xf32> to vector<16x16x128xf32>
    %63 = arith.addf %62, %1 : vector<16x16x128xf32>
    %c0_26 = arith.constant 0 : index
    %c0_27 = arith.constant 0 : index
    %c0_28 = arith.constant 0 : index
    %c0_29 = arith.constant 0 : index
    %64 = vector.load %arg9[%c0_26, %c0_27, %c0_28, %c0_29] : memref<1x16x16x128xf32, #tpu.memory_space<vmem>>, vector<1x16x16x128xf32>
    %65 = vector.shape_cast %64 : vector<1x16x16x128xf32> to vector<16x16x128xf32>
    %66 = vector.shape_cast %63 : vector<16x16x128xf32> to vector<1x16x16x128xf32>
    tpu.vector_store %arg9[%c0_26, %c0_27, %c0_28, %c0_29], %66 {strides = array<i32>} : memref<1x16x16x128xf32, #tpu.memory_space<vmem>>, vector<1x16x16x128xf32>,
    return
  }
  func.func @transform_0(%arg0: i32, %arg1: i32) -> (i32, i32, i32, i32) {
    %c0_i32 = arith.constant 0 : i32
    %c0_i32_0 = arith.constant 0 : i32
    %c0_i32_1 = arith.constant 0 : i32
    return %arg0, %arg1, %c0_i32, %c0_i32_0 : i32, i32, i32, i32
  }
  func.func @transform_1(%arg0: i32, %arg1: i32) -> (i32, i32, i32, i32) {
    %c16_i32 = arith.constant 16 : i32
    %0 = arith.muli %arg1, %c16_i32 : i32
    %c1_i32 = arith.constant 1 : i32
    %1 = arith.subi %0, %c1_i32 : i32
    %c0_i32 = arith.constant 0 : i32
    %2 = arith.maxsi %1, %c0_i32 : i32
    %c0_i32_0 = arith.constant 0 : i32
    %c0_i32_1 = arith.constant 0 : i32
    %c0_i32_2 = arith.constant 0 : i32
    return %arg0, %2, %c0_i32_0, %c0_i32_1 : i32, i32, i32, i32
  }
  func.func @transform_2(%arg0: i32, %arg1: i32) -> (i32, i32, i32, i32) {
    %c16_i32 = arith.constant 16 : i32
    %0 = arith.muli %arg1, %c16_i32 : i32
    %c16_i32_0 = arith.constant 16 : i32
    %1 = arith.addi %0, %c16_i32_0 : i32
    %c15_i32 = arith.constant 15 : i32
    %2 = arith.minsi %1, %c15_i32 : i32
    %c0_i32 = arith.constant 0 : i32
    %c0_i32_1 = arith.constant 0 : i32
    %c0_i32_2 = arith.constant 0 : i32
    return %arg0, %2, %c0_i32, %c0_i32_1 : i32, i32, i32, i32
  }
  func.func @transform_3(%arg0: i32, %arg1: i32) -> (i32, i32) {
    %c0_i32 = arith.constant 0 : i32
    %c0_i32_0 = arith.constant 0 : i32
    %c0_i32_1 = arith.constant 0 : i32
    return %c0_i32, %c0_i32_0 : i32, i32
  }
  func.func @transform_4(%arg0: i32, %arg1: i32) -> (i32, i32) {
    %c0_i32 = arith.constant 0 : i32
    %c0_i32_0 = arith.constant 0 : i32
    %c0_i32_1 = arith.constant 0 : i32
    return %c0_i32, %c0_i32_0 : i32, i32
  }
  func.func @transform_5(%arg0: i32, %arg1: i32) -> (i32, i32) {
    %c0_i32 = arith.constant 0 : i32
    %c0_i32_0 = arith.constant 0 : i32
    %c0_i32_1 = arith.constant 0 : i32
    return %c0_i32, %c0_i32_0 : i32, i32
  }
  func.func @transform_6(%arg0: i32, %arg1: i32) -> (i32, i32) {
    %c0_i32 = arith.constant 0 : i32
    %c0_i32_0 = arith.constant 0 : i32
    %c0_i32_1 = arith.constant 0 : i32
    return %c0_i32, %c0_i32_0 : i32, i32
  }
  func.func @transform_7(%arg0: i32, %arg1: i32) -> (i32, i32, i32, i32) {
    %c0_i32 = arith.constant 0 : i32
    %c0_i32_0 = arith.constant 0 : i32
    %c0_i32_1 = arith.constant 0 : i32
    return %arg0, %arg1, %c0_i32, %c0_i32_0 : i32, i32, i32, i32
  }
}

</mosaic_0001>

<bundles_post_ra>
// kernel: bottleneck_forward.1
= control target key start
LH: loop header
LB: loop body
LE: loop exit
PB: predicated region body
PF: predicated region fallthrough
CT: control target
= control target key end

     0   :  { %s4341_s24 = smov 0   ;;  %s4343_s25 = smov 0   ;;  %s5554_s0 = inlined_call_operand.vmem [shape: f32[2,16,16,128], index: 0, kind: input, shape index: {}, may-alias: {0,1,2}]   ;;  %s5555_s1 = inlined_call_operand.vmem [shape: f32[2,16,16,128], index: 1, kind: input, shape index: {}, may-alias: {0,1,2}]   ;;  %s5556_s2 = inlined_call_operand.vmem [shape: f32[2,16,16,128], index: 2, kind: input, shape index: {}, may-alias: {0,1,2}]   ;;  %s5557_s3 = inlined_call_operand.vmem [shape: bf16[128,128], index: 3, kind: input, shape index: {}]   ;;  %s5558_s4 = inlined_call_operand.vmem [shape: f32[1,128], index: 4, kind: input, shape index: {}]   ;;  %s5559_s5 = inlined_call_operand.vmem [shape: bf16[1152,128], index: 5, kind: input, shape index: {}]   ;;  %s5560_s6 = inlined_call_operand.vmem [shape: f32[1,128], index: 6, kind: input, shape index: {}]   ;;  %s5561_s7 = inlined_call_operand.vmem [shape: f32[2,16,16,128], index: 7, kind: output, shape index: {}]  }
   0x1   :  { %s4345_s26 = smov 0  }
   0x2 LB: > { %s29_s27 = sadd.s32 1, %s4295_s25  ;;  %p3444_p0 = scmp.ge.s32.totalorder %s4299_s26, 1  ;;  %s4299_s26 = sphi %s4345_s26, %s17_s26   ;;  %s4295_s25 = sphi %s4343_s25, %s5565_s25   ;;  %s4291_s24 = sphi %s4341_s24, %s5564_s24  }
   0x3   : > { %p31_p1 = scmp.ge.s32.totalorder %s29_s27, 2  ;;  %p323_p2 = scmp.lt.s32.totalorder %s4299_s26, 3 }
   0x5   : > { %s5567_s27 = smov (%p31_p1, %s29_s27), 0  ;;  %p324_p3 = pnand %p3444_p0, %p323_p2 }
   0x6   : > { %v4165_v0 = vld [vmem:[%s5557_s3] sm:$0xff] (!%p324_p3)   ;;  %p392_p4 = scmp.lt.s32.totalorder (!%p324_p3), %s4291_s24, 1  ;;  %v4166_v1 = vld [vmem:[%s5557_s3 + $0x8] sm:$0xff] (!%p324_p3)   ;;  %v4167_v2 = vld [vmem:[%s5557_s3 + $0x10] sm:$0xff] (!%p324_p3)   ;;  %vm1371_vm4 = vcmask (!%p324_p3), 1040384   ;;  %vm1651_vm10 = vcmask (!%p324_p3), 1046528  }
   0x7   : > { %327 = sbr.rel (%p324_p3) target bundleno = 816 (0x330), region = 48  ;;  %4041 = vmatprep.subr.bf16.mxu0 (!%p324_p3), %v4165_v0  ;;  %v4168_v3 = vld [vmem:[%s5557_s3 + $0x18] sm:$0xff] (!%p324_p3)   ;;  %v4169_v7 = vld [vmem:[%s5557_s3 + $0x20] sm:$0xff] (!%p324_p3)   ;;  %v4170_v8 = vld [vmem:[%s5557_s3 + $0x28] sm:$0xff] (!%p324_p3)   ;;  %vm1372_vm5 = vsmask.f32 (!%p324_p3), 256 }
   0x8   : > { %4042 = vmatpush3.bf16.msra.mxu0 (!%p324_p3), %v4165_v0  ;;  %v4171_v9 = vld [vmem:[%s5557_s3 + $0x30] sm:$0xff] (!%p324_p3)   ;;  %v4175_v10 = vld [vmem:[%s5559_s5 + $0x40] sm:$0xff] (!%p324_p3)   ;;  %v4172_v11 = vld [vmem:[%s5557_s3 + $0x38] sm:$0xff] (!%p324_p3)   ;;  %vm1410_vm13 = vsmask.f32 (!%p324_p3), 7424 }
   0x9   : > { %4043 = vmatprep.subr.bf16.mxu0 (!%p324_p3), %v4166_v1  ;;  %3569 = vmatprep.subr.bf16.mxu1 (!%p324_p3), %v4175_v10  ;;  %v4177_v12 = vld [vmem:[%s5559_s5] sm:$0xff] (!%p324_p3)   ;;  %v4179_v17 = vld [vmem:[%s5559_s5 + $0x48] sm:$0xff] (!%p324_p3)   ;;  %v4180_v28 = vld [vmem:[%s5559_s5 + $0xd0] sm:$0xff] (!%p324_p3)  }
   0xa   : > { %3570 = vmatpush3.bf16.msra.mxu1 (!%p324_p3), %v4177_v12  ;;  %v4173_v18 = vld [vmem:[%s5559_s5 + $0xc0] sm:$0xff] (!%p324_p3)   ;;  %v4176_v21 = vld [vmem:[%s5559_s5 + $0xc8] sm:$0xff] (!%p324_p3)   ;;  %v4186_v10 = vld [vmem:[%s5559_s5 + $0x98] sm:$0xff] (!%p324_p3)  }
   0xb   : > { %3571 = vmatprep.subr.bf16.mxu1 (!%p324_p3), %v4179_v17  ;;  %v4174_v19 = vld [vmem:[%s5559_s5 + $0x80] sm:$0xff] (!%p324_p3)   ;;  %v4178_v25 = vld [vmem:[%s5559_s5 + $0x88] sm:$0xff] (!%p324_p3)   ;;  %vm4546_vm7 = vmand (!%p324_p3), %vm1371_vm4, %vm1372_vm5 }
   0xc   : > { %4044 = vmatpush3.bf16.msra.mxu0 (!%p324_p3), %v4166_v1  ;;  %v4188_v12 = vld [vmem:[%s5559_s5 + $0xe0] sm:$0xff] (!%p324_p3)  }
   0xd   : > { %4045 = vmatprep.subr.bf16.mxu0 (!%p324_p3), %v4167_v2  ;;  %v4191_v17 = vld [vmem:[%s5559_s5 + $0x60] sm:$0xff] (!%p324_p3)  }
   0xe   : > { %s5569_s24 = smov (!%p392_p4, %s4291_s24), 1 }
   0xf   : > { %s4368_s11 = sshll.u32 %s5569_s24, 8 }
  0x10   : > { %s414_s14 = scalar_lea.vmem %s5555_s1, %s4368_s11  ;;  %4046 = vmatpush3.bf16.msra.mxu0 %v4167_v2  ;;  %s4390_s28 = scalar_lea.vmem %s5554_s0, %s4368_s11 }
  0x11   : > { %v480_v4 = vld [vmem:[%s414_s14] sm:$0xff]  ;;  %v481_v5 = vld [vmem:[%s414_s14 + $0x8] sm:$0xff]  ;;  %4047 = vmatprep.subr.bf16.mxu0 %v4168_v3  ;;  %v450_v15 = vld [vmem:[%s4390_s28 + $0x10] sm:$0xff]  ;;  %s3540_s29 = sadd.s32 240, %s4368_s11  ;;  %s5451_s19 = scalar_lea.vmem %s5561_s7, %s4368_s11 }
  0x12   : > { %v482_v6 = vpack.c.bf16 %v481_v5, %v480_v4  ;;  %v448_v13 = vld [vmem:[%s4390_s28] sm:$0xff]  ;;  %v449_v14 = vld [vmem:[%s4390_s28 + $0x8] sm:$0xff]  ;;  %v451_v16 = vld [vmem:[%s4390_s28 + $0x18] sm:$0xff]  ;;  %s431_s9 = scalar_lea.vmem %s5556_s2, %s3540_s29 }
  0x13   : > { %v483_v20 = vpack.c.bf16 %v449_v14, %v448_v13  ;;  %v484_v22 = vpack.c.bf16 %v451_v16, %v450_v15  ;;  %v452_v23 = vld [vmem:[%s4390_s28 + $0x20] sm:$0xff]  ;;  %v453_v24 = vld [vmem:[%s4390_s28 + $0x28] sm:$0xff]  ;;  %v454_v26 = vld [vmem:[%s4390_s28 + $0x30] sm:$0xff] }
  0x14   : > { %4057 = vmatprep.mubr.bf16.mxu0 %v482_v6  ;;  %4048 = vmatpush3.bf16.msra.mxu0 %v4168_v3  ;;  %v455_v27 = vld [vmem:[%s4390_s28 + $0x38] sm:$0xff]  ;;  %v485_v29 = vpack.c.bf16 %v453_v24, %v452_v23  ;;  %v456_v31 = vld [vmem:[%s4390_s28 + $0x40] sm:$0xff]  ;;  %v457_v32 = vld [vmem:[%s4390_s28 + $0x48] sm:$0xff] }
  0x15   : > { %4049 = vmatprep.subr.bf16.mxu0 %v4169_v7  ;;  %v486_v30 = vpack.c.bf16 %v455_v27, %v454_v26  ;;  %v458_v33 = vld [vmem:[%s4390_s28 + $0x50] sm:$0xff]  ;;  %v459_v34 = vld [vmem:[%s4390_s28 + $0x58] sm:$0xff]  ;;  %v487_v35 = vpack.c.bf16 %v457_v32, %v456_v31  ;;  %v460_v37 = vld [vmem:[%s4390_s28 + $0x60] sm:$0xff] }
  0x16   : > { %v488_v36 = vpack.c.bf16 %v459_v34, %v458_v33  ;;  %v461_v38 = vld [vmem:[%s4390_s28 + $0x68] sm:$0xff]  ;;  %v462_v39 = vld [vmem:[%s4390_s28 + $0x70] sm:$0xff]  ;;  %v463_v40 = vld [vmem:[%s4390_s28 + $0x78] sm:$0xff] }
  0x17   : > { %v489_v41 = vpack.c.bf16 %v461_v38, %v460_v37  ;;  %v490_v42 = vpack.c.bf16 %v463_v40, %v462_v39  ;;  %v464_v43 = vld [vmem:[%s4390_s28 + $0x80] sm:$0xff]  ;;  %v465_v44 = vld [vmem:[%s4390_s28 + $0x88] sm:$0xff]  ;;  %v466_v45 = vld [vmem:[%s4390_s28 + $0x90] sm:$0xff] }
  0x18   : > { %4050 = vmatpush3.bf16.msra.mxu0 %v4169_v7  ;;  %v467_v46 = vld [vmem:[%s4390_s28 + $0x98] sm:$0xff]  ;;  %v491_v47 = vpack.c.bf16 %v465_v44, %v464_v43  ;;  %v468_v49 = vld [vmem:[%s4390_s28 + $0xa0] sm:$0xff]  ;;  %v469_v50 = vld [vmem:[%s4390_s28 + $0xa8] sm:$0xff] }
  0x19   : > { %4051 = vmatprep.subr.bf16.mxu0 %v4170_v8  ;;  %v492_v48 = vpack.c.bf16 %v467_v46, %v466_v45  ;;  %v470_v51 = vld [vmem:[%s4390_s28 + $0xb0] sm:$0xff]  ;;  %v471_v52 = vld [vmem:[%s4390_s28 + $0xb8] sm:$0xff]  ;;  %v493_v53 = vpack.c.bf16 %v469_v50, %v468_v49  ;;  %v472_v55 = vld [vmem:[%s4390_s28 + $0xc0] sm:$0xff] }
  0x1a   : > { %v494_v54 = vpack.c.bf16 %v471_v52, %v470_v51  ;;  %v473_v56 = vld [vmem:[%s4390_s28 + $0xc8] sm:$0xff]  ;;  %v474_v57 = vld [vmem:[%s4390_s28 + $0xd0] sm:$0xff]  ;;  %v475_v58 = vld [vmem:[%s4390_s28 + $0xd8] sm:$0xff] }
  0x1b   : > { %v495_v59 = vpack.c.bf16 %v473_v56, %v472_v55  ;;  %v496_v60 = vpack.c.bf16 %v475_v58, %v474_v57  ;;  %v476_v61 = vld [vmem:[%s4390_s28 + $0xe0] sm:$0xff]  ;;  %v477_v62 = vld [vmem:[%s4390_s28 + $0xe8] sm:$0xff]  ;;  %v478_v63 = vld [vmem:[%s4390_s28 + $0xf0] sm:$0xff] }
  0x1c   : > { %4052 = vmatpush3.bf16.msra.mxu0 %v4170_v8  ;;  %v479_v0 = vld [vmem:[%s4390_s28 + $0xf8] sm:$0xff]  ;;  %v497_v1 = vpack.c.bf16 %v477_v62, %v476_v61  ;;  %v499_v3 = vld [vmem:[%s431_s9] sm:$0xff]  ;;  %v500_v4 = vld [vmem:[%s431_s9 + $0x8] sm:$0xff] }
  0x1d   : > { %4053 = vmatprep.subr.bf16.mxu0 %v4171_v9  ;;  %v498_v2 = vpack.c.bf16 %v479_v0, %v478_v63  ;;  %v501_v5 = vpack.c.bf16 %v500_v4, %v499_v3  ;;  %v4182_v6 = vld [vmem:[%s5559_s5 + $0x90] sm:$0xff]   ;;  %v4181_v7 = vld [vmem:[%s5559_s5 + $0x8] sm:$0xff]   ;;  %v4184_v8 = vld [vmem:[%s5559_s5 + $0xd8] sm:$0xff]  }
  0x1e   : > { %3572 = vmatpush3.bf16.msra.mxu1 %v4181_v7  ;;  %v4187_v13 = vld [vmem:[%s5559_s5 + $0x58] sm:$0xff]   ;;  %v4190_v14 = vld [vmem:[%s5559_s5 + $0xa0] sm:$0xff]   ;;  %v4192_v16 = vld [vmem:[%s5559_s5 + $0xe8] sm:$0xff]  }
  0x1f   : > { %v4189_v15 = vld [vmem:[%s5559_s5 + $0x18] sm:$0xff]   ;;  %v4197_v23 = vld [vmem:[%s5559_s5 + $0x28] sm:$0xff]   ;;  %v4201_v27 = vld [vmem:[%s5559_s5 + $0x30] sm:$0xff]  }
  0x20   : > { %4054 = vmatpush3.bf16.msra.mxu0 %v4171_v9  ;;  %v4183_v9 = vld [vmem:[%s5559_s5 + $0x50] sm:$0xff]   ;;  %v4200_v24 = vld [vmem:[%s5559_s5 + $0xf8] sm:$0xff]   ;;  %v4213_v31 = vld [vmem:[%s5559_s5 + $0x1c0] sm:$0xff]  }
  0x21   : > { %4055 = vmatprep.subr.bf16.mxu0 %v4172_v11  ;;  %3573 = vmatprep.subr.bf16.mxu1 %v4183_v9  ;;  %v4202_v26 = vld [vmem:[%s5559_s5 + $0xb8] sm:$0xff]   ;;  %v4536_v32 = vld [vmem:[%s5558_s4] ss:$0 sm:$0xff] }
  0x24   : > { %4056 = vmatpush3.bf16.msra.mxu0 %v4172_v11  ;;  %v4185_v11 = vld [vmem:[%s5559_s5 + $0x10] sm:$0xff]  }
  0x25   : > { %3681 = vmatprep.subr.bf16.mxu0 %v4173_v18  ;;  %3574 = vmatpush3.bf16.msra.mxu1 %v4185_v11  ;;  %v4194_v18 = vld [vmem:[%s5559_s5 + $0xa8] sm:$0xff]  }
  0x26   : > { %3575 = vmatprep.subr.bf16.mxu1 %v4187_v13 }
  0x27   : > { %4058 = vmatmul.mubr.bf16.vlgmr.msra.gmra.mrb[0].mxu0 %v483_v20  ;;  %v4196_v20 = vld [vmem:[%s5559_s5 + $0xf0] sm:$0xff]  }
  0x28   : > { %4061 = vmatprep.mubr.bf16.mxu0 %v484_v22  ;;  %3682 = vmatpush3.bf16.msra.mxu0 %v4174_v19  ;;  %v4193_v19 = vld [vmem:[%s5559_s5 + $0x20] sm:$0xff]   ;;  %v4198_v22 = vld [vmem:[%s5559_s5 + $0xb0] sm:$0xff]  }
  0x29   : > { %3683 = vmatprep.subr.bf16.mxu0 %v4176_v21  ;;  %3576 = vmatpush3.bf16.msra.mxu1 %v4189_v15  ;;  %v4195_v21 = vld [vmem:[%s5559_s5 + $0x68] sm:$0xff]  }
  0x2a   : > { %3577 = vmatprep.subr.bf16.mxu1 %v4191_v17 }
  0x2c   : > { %3684 = vmatpush3.bf16.msra.mxu0 %v4178_v25  ;;  %v4199_v25 = vld [vmem:[%s5559_s5 + $0x70] sm:$0xff]  }
  0x2d   : > { %3685 = vmatprep.subr.bf16.mxu0 %v4180_v28  ;;  %3578 = vmatpush3.bf16.msra.mxu1 %v4193_v19  ;;  %v4203_v28 = vld [vmem:[%s5559_s5 + $0x78] sm:$0xff]  }
  0x2e   : > { %3579 = vmatprep.subr.bf16.mxu1 %v4195_v21 }
  0x2f   : > { %4062 = vmatmul.mubr.bf16.gmra.mrb[4].mxu0 %v485_v29  ;;  %v4204_v29 = vld [vmem:[%s5559_s5 + $0x38] sm:$0xff]  }
  0x30   : > { %4065 = vmatprep.mubr.bf16.mxu0 %v486_v30  ;;  %3686 = vmatpush3.bf16.msra.mxu0 %v4182_v6  ;;  %v4205_v30 = vld [vmem:[%s5559_s5 + $0x140] sm:$0xff]  }
  0x31   : > { %3687 = vmatprep.subr.bf16.mxu0 %v4184_v8  ;;  %3580 = vmatpush3.bf16.msra.mxu1 %v4197_v23 }
  0x32   : > { %3581 = vmatprep.subr.bf16.mxu1 %v4199_v25 }
  0x34   : > { %3688 = vmatpush3.bf16.msra.mxu0 %v4186_v10 }
  0x35   : > { %3689 = vmatprep.subr.bf16.mxu0 %v4188_v12  ;;  %3582 = vmatpush3.bf16.msra.mxu1 %v4201_v27 }
  0x36   : > { %3583 = vmatprep.subr.bf16.mxu1 %v4203_v28 }
  0x37   : > { %4066 = vmatmul.mubr.bf16.gmra.mrb[8].mxu0 %v487_v35 }
  0x38   : > { %4069 = vmatprep.mubr.bf16.mxu0 %v488_v36  ;;  %3690 = vmatpush3.bf16.msra.mxu0 %v4190_v14 }
  0x39   : > { %3691 = vmatprep.subr.bf16.mxu0 %v4192_v16  ;;  %3584 = vmatpush3.bf16.msra.mxu1 %v4204_v29 }
  0x3a   : > { %3793 = vmatprep.subr.bf16.mxu1 %v4205_v30 }
  0x3c   : > { %3692 = vmatpush3.bf16.msra.mxu0 %v4194_v18 }
  0x3d   : > { %3693 = vmatprep.subr.bf16.mxu0 %v4196_v20 }
  0x3f   : > { %4070 = vmatmul.mubr.bf16.gmra.mrb[12].mxu0 %v489_v41 }
  0x40   : > { %4073 = vmatprep.mubr.bf16.mxu0 %v490_v42  ;;  %3694 = vmatpush3.bf16.msra.mxu0 %v4198_v22 }
  0x41   : > { %3695 = vmatprep.subr.bf16.mxu0 %v4200_v24 }
  0x44   : > { %3696 = vmatpush3.bf16.msra.mxu0 %v4202_v26 }
  0x45   : > { %3905 = vmatprep.subr.bf16.mxu0 %v4213_v31 }
  0x47   : > { %4074 = vmatmul.mubr.bf16.gmra.mrb[16].mxu0 %v491_v47 }
  0x48   : > { %4077 = vmatprep.mubr.bf16.mxu0 %v492_v48 }
  0x4f   : > { %4078 = vmatmul.mubr.bf16.gmra.mrb[20].mxu0 %v493_v53 }
  0x50   : > { %4081 = vmatprep.mubr.bf16.mxu0 %v494_v54 }
  0x57   : > { %4082 = vmatmul.mubr.bf16.gmra.mrb[24].mxu0 %v495_v59 }
  0x58   : > { %4085 = vmatprep.mubr.bf16.mxu0 %v496_v60 }
  0x5f   : > { %4086 = vmatmul.mubr.bf16.gmra.mrb[28].mxu0 %v497_v1 }
  0x60   : > { %4089 = vmatprep.mubr.bf16.mxu0 %v498_v2 }
  0x67   : > { %4090 = vmatmul.mubr.bf16.gmra.mrb[32].mxu0 %v501_v5 }
  0xfa   : > { %v4059_v33 = vpop.f32.mrb[0].mxu0 }
  0xfb   : > { %v616_v34 = vadd.f32 %v4059_v33, %v4536_v32  ;;  %v607_v35 = vpop.f32.mrb[1].mxu0 }
  0xfc   : > { %v608_v36 = vadd.f32 %v4536_v32, %v607_v35  ;;  %v4060_v37 = vpop.f32.mrb[2].mxu0 }
  0xfd   : > { %v788_v38 = vmul.f32 0.1, %v616_v34  ;;  %v619_v39 = vadd.f32 %v4060_v37, %v4536_v32  ;;  %v610_v40 = vpop.f32.mrb[3].mxu0  ;;  %vm752_vm0 = vcmp.ge.f32.partialorder %v616_v34, 0.0 }
  0xfe   : > { %vm750_vm1 = vcmp.ge.f32.partialorder %v608_v36, 0.0  ;;  %v786_v41 = vmul.f32 0.1, %v608_v36  ;;  %v611_v42 = vadd.f32 %v4536_v32, %v610_v40  ;;  %v4217_v40 = vld [vmem:[%s5559_s5 + $0x1c8] sm:$0xff]  }
  0xff   : > { %vm753_vm2 = vcmp.ge.f32.partialorder %v619_v39, 0.0  ;;  %v789_v43 = vmul.f32 0.1, %v619_v39  ;;  %v824_v46 = vsel %vm752_vm0, %v616_v34, %v788_v38 }
 0x100   : > { %v822_v44 = vsel %vm750_vm1, %v608_v36, %v786_v41  ;;  %vm751_vm3 = vcmp.ge.f32.partialorder %v611_v42, 0.0  ;;  %v787_v45 = vmul.f32 0.1, %v611_v42  ;;  %v4214_v36 = vld [vmem:[%s5559_s5 + $0x180] sm:$0xff]  }
 0x101   : > { %v825_v47 = vsel %vm753_vm2, %v619_v39, %v789_v43  ;;  %v1155_v51 = vmul.f32 0.0, %v822_v44 }
 0x102   : > { %v1192_v48 = vpack.c.bf16 %v825_v47, %v824_v46  ;;  %v823_v49 = vsel %vm751_vm3, %v611_v42, %v787_v45  ;;  %v4063_v50 = vpop.f32.mrb[4].mxu0 }
 0x103   : > { %v1156_v52 = vmul.f32 0.0, %v823_v49  ;;  %v632_v53 = vadd.f32 %v4063_v50, %v4536_v32  ;;  %v623_v54 = vpop.f32.mrb[5].mxu0 }
 0x104   : > { %v1217_v55 = vshrl.u32 %v1192_v48, 16  ;;  %v624_v56 = vadd.f32 %v4536_v32, %v623_v54  ;;  %v4064_v57 = vpop.f32.mrb[6].mxu0  ;;  %v1220_v2 = vshll.u32 %v1192_v48, 16 }
 0x105   : > { %v1191_v58 = vpack.c.bf16 %v1156_v52, %v1155_v51  ;;  %vm756_vm6 = vcmp.ge.f32.partialorder %v632_v53, 0.0  ;;  %v792_v59 = vmul.f32 0.1, %v632_v53  ;;  %v635_v60 = vadd.f32 %v4064_v57, %v4536_v32  ;;  %v626_v61 = vpop.f32.mrb[7].mxu0 }
 0x106   : > { %v1219_v62 = vrot.slane %v1217_v55, 7  ;;  %vm754_vm8 = vcmp.ge.f32.partialorder %v624_v56, 0.0  ;;  %v790_v0 = vmul.f32 0.1, %v624_v56  ;;  %v627_v1 = vadd.f32 %v4536_v32, %v626_v61 }
 0x107   : > { %v1210_v3 = vshrl.u32 %v1191_v58, 16  ;;  %v828_v4 = vsel %vm756_vm6, %v632_v53, %v792_v59  ;;  %vm757_vm9 = vcmp.ge.f32.partialorder %v635_v60, 0.0  ;;  %v793_v6 = vmul.f32 0.1, %v635_v60  ;;  %v4218_v53 = vld [vmem:[%s5559_s5 + $0x188] sm:$0xff]   ;;  %v4221_v59 = vld [vmem:[%s5559_s5 + $0x1d0] sm:$0xff]  }
 0x108   : > { %v826_v5 = vsel %vm754_vm8, %v624_v56, %v790_v0  ;;  %vm755_vm11 = vcmp.ge.f32.partialorder %v627_v1, 0.0  ;;  %v791_v7 = vmul.f32 0.1, %v627_v1  ;;  %v1213_v9 = vshll.u32 %v1191_v58, 16 }
 0x109   : > { %v1212_v8 = vrot.slane %v1210_v3, 7  ;;  %v1222_v10 = vor.u32 %v1220_v2, %v1219_v62  ;;  %v4553_v11 = vsel %vm4546_vm7, %v1219_v62, 0  ;;  %v829_v12 = vsel %vm757_vm9, %v635_v60, %v793_v6  ;;  %v4206_v6 = vld [vmem:[%s5559_s5 + $0x100] sm:$0xff]  }
 0x10a   : > { %v827_v13 = vsel %vm755_vm11, %v627_v1, %v791_v7  ;;  %v4067_v14 = vpop.f32.mrb[8].mxu0  ;;  %v1431_v15 = vshll.u32 %v4553_v11, 16  ;;  %v1656_v16 = vrot.slane %v4553_v11, 1  ;;  %v1194_v18 = vpack.c.bf16 %v829_v12, %v828_v4  ;;  %v4207_v11 = vld [vmem:[%s5559_s5 + $0x148] sm:$0xff]  }
 0x10b   : > { %v1215_v17 = vor.u32 %v1213_v9, %v1212_v8  ;;  %v1193_v19 = vpack.c.bf16 %v827_v13, %v826_v5  ;;  %v4559_v20 = vsel %vm4546_vm7, 0, %v1222_v10  ;;  %v639_v21 = vpop.f32.mrb[9].mxu0  ;;  %v1392_v22 = vsel %vm4546_vm7, %v1212_v8, 0 }
 0x10c   : > { %2530 = vmatprep.mubr.bf16.mxu0 %v4559_v20  ;;  %v648_v23 = vadd.f32 %v4067_v14, %v4536_v32  ;;  %v640_v24 = vadd.f32 %v4536_v32, %v639_v21  ;;  %v4068_v25 = vpop.f32.mrb[10].mxu0  ;;  %v1424_v26 = vshrl.u32 %v4559_v20, 16  ;;  %v1231_v28 = vshrl.u32 %v1194_v18, 16  ;;  %v4222_v21 = vld [vmem:[%s5559_s5 + $0x190] sm:$0xff]  }
 0x10d   : > { %v4569_v27 = vsel %vm4546_vm7, 0, %v1215_v17  ;;  %v1234_v29 = vshll.u32 %v1194_v18, 16  ;;  %v1224_v30 = vshrl.u32 %v1193_v19, 16  ;;  %v642_v31 = vpop.f32.mrb[11].mxu0  ;;  %v1227_v33 = vshll.u32 %v1193_v19, 16 }
 0x10e   : > { %v1652_v34 = vrot.slane %v4569_v27, 1  ;;  %v1653_v35 = vrot.slane %v1392_v22, 1  ;;  %vm760_vm12 = vcmp.ge.f32.partialorder %v648_v23, 0.0  ;;  %v4575_v37 = vrot.slane %v1231_v28, 7 }
 0x10f   : > { %v1226_v38 = vrot.slane %v1224_v30, 7  ;;  %v796_v39 = vmul.f32 0.1, %v648_v23  ;;  %vm758_vm14 = vcmp.ge.f32.partialorder %v640_v24, 0.0  ;;  %v794_v42 = vmul.f32 0.1, %v640_v24 }
 0x110   : > { %v1654_v41 = vsel %vm1651_vm10, %v1652_v34, %v1653_v35  ;;  %v651_v43 = vadd.f32 %v4068_v25, %v4536_v32  ;;  %v1412_v44 = vshrl.u32 %v4569_v27, 16  ;;  %v1236_v45 = vor.u32 %v1234_v29, %v4575_v37 }
 0x111   : > { %v1229_v46 = vor.u32 %v1227_v33, %v1226_v38  ;;  %2531 = vmatmul.mubr.bf16.vlgmr.msra.gmra.mrb[36].mxu0 %v1654_v41  ;;  %v832_v47 = vsel %vm760_vm12, %v648_v23, %v796_v39  ;;  %v1414_v48 = vshll.u32 %v4569_v27, 16  ;;  %v830_v49 = vsel %vm758_vm14, %v640_v24, %v794_v42 }
 0x112   : > { %vm761_vm15 = vcmp.ge.f32.partialorder %v651_v43, 0.0  ;;  %v797_v50 = vmul.f32 0.1, %v651_v43  ;;  %v1419_v51 = vshll.u32 %v1392_v22, 16  ;;  %v4071_v52 = vpop.f32.mrb[12].mxu0  ;;  %3906 = vmatpush3.bf16.msra.mxu0 %v4214_v36  ;;  %v643_v55 = vadd.f32 %v4536_v32, %v642_v31 }
 0x113   : > { %v1416_v54 = vrot.slane %v1414_v48, 1  ;;  %v1426_v56 = vshll.u32 %v4559_v20, 16  ;;  %v1433_v57 = vrot.slane %v1431_v15, 1  ;;  %v655_v58 = vpop.f32.mrb[13].mxu0  ;;  %3907 = vmatprep.subr.bf16.mxu0 %v4217_v40  ;;  %v4595_v62 = vsel %vm4546_vm7, 0, %v1229_v46  ;;  %v4209_v40 = vld [vmem:[%s5559_s5 + $0x150] sm:$0xff]  }
 0x114   : > { %v833_v60 = vsel %vm761_vm15, %v651_v43, %v797_v50  ;;  %v1421_v61 = vrot.slane %v1419_v51, 1  ;;  %v1655_v0 = vrot.slane %v4559_v20, 1  ;;  %v4072_v1 = vpop.f32.mrb[14].mxu0  ;;  %vm759_vm0 = vcmp.ge.f32.partialorder %v643_v55, 0.0  ;;  %2538 = vmatprep.mubr.bf16.mxu0 %v4595_v62  ;;  %v4226_v46 = vld [vmem:[%s5559_s5 + $0x198] sm:$0xff]  }
 0x115   : > { %v1196_v2 = vpack.c.bf16 %v833_v60, %v832_v47  ;;  %v1417_v3 = vor.u32 %v1416_v54, %v1412_v44  ;;  %v795_v4 = vmul.f32 0.1, %v643_v55  ;;  %v658_v5 = vpop.f32.mrb[15].mxu0  ;;  %v1428_v7 = vrot.slane %v1426_v56, 1  ;;  %v4210_v56 = vld [vmem:[%s5559_s5 + $0x110] sm:$0xff]  }
 0x116   : > { %v4605_v8 = vsel %vm1651_vm10, %v1655_v0, %v1656_v16  ;;  %v4609_v9 = vsel %vm4546_vm7, 0, %v1236_v45  ;;  %v1394_v10 = vsel %vm4546_vm7, %v1226_v38, 0  ;;  %3908 = vmatpush3.bf16.msra.mxu0 %v4218_v53  ;;  %v1436_v18 = vshrl.u32 %v4595_v62, 16  ;;  %v4228_v0 = vld [vmem:[%s5559_s5 + $0x1a0] sm:$0xff]  }
 0x117   : > { %v1245_v12 = vshrl.u32 %v1196_v2, 16  ;;  %v1248_v13 = vshll.u32 %v1196_v2, 16  ;;  %v1422_v14 = vsel %vm1410_vm13, %v1417_v3, %v1421_v61  ;;  %v831_v15 = vsel %vm759_vm0, %v643_v55, %v795_v4  ;;  %3909 = vmatprep.subr.bf16.mxu0 %v4221_v59  ;;  %v4211_v61 = vld [vmem:[%s5559_s5 + $0x158] sm:$0xff]  }
 0x118   : > { %2369 = vmatprep.mubr.bf16.mxu1 %v1422_v14  ;;  %v1195_v16 = vpack.c.bf16 %v831_v15, %v830_v49  ;;  %v1429_v17 = vor.u32 %v1428_v7, %v1424_v26  ;;  %v1438_v19 = vshll.u32 %v4595_v62, 16  ;;  %v1443_v23 = vshll.u32 %v1394_v10, 16  ;;  %v4225_v26 = vld [vmem:[%s5559_s5 + $0x1d8] sm:$0xff]  }
 0x119   : > { %v4624_v22 = vrot.slane %v1245_v12, 7  ;;  %2370 = vmatmul.mubr.bf16.vlgmr.msra.gmra.mrb[0].mxu1 %v4569_v27  ;;  %2539 = vmatmul.mubr.bf16.gmra.mrb[40].mxu0 %v4605_v8  ;;  %v1658_v24 = vrot.slane %v4595_v62, 1  ;;  %v1659_v25 = vrot.slane %v1394_v10, 1  ;;  %v4208_v27 = vld [vmem:[%s5559_s5 + $0x108] sm:$0xff]   ;;  %v664_v38 = vadd.f32 %v4071_v52, %v4536_v32  ;;  %v4212_v15 = vld [vmem:[%s5559_s5 + $0x118] sm:$0xff]  }
 0x11a   : > { %v1238_v28 = vshrl.u32 %v1195_v16, 16  ;;  %v1241_v29 = vshll.u32 %v1195_v16, 16  ;;  %3794 = vmatpush3.bf16.msra.mxu1 %v4206_v6  ;;  %v4633_v30 = vsel %vm1410_vm13, %v1429_v17, %v1433_v57  ;;  %2546 = vmatprep.mubr.bf16.mxu0 %v4609_v9  ;;  %v1440_v31 = vrot.slane %v1438_v19, 1  ;;  %v4639_v33 = vpop.f32.mrb[16].mxu0  ;;  %v4232_v19 = vld [vmem:[%s5559_s5 + $0x1a8] sm:$0xff]  }
 0x11b   : > { %v4642_v34 = vor.u32 %v1248_v13, %v4624_v22  ;;  %2377 = vmatprep.mubr.bf16.mxu1 %v4633_v30  ;;  %v1445_v35 = vrot.slane %v1443_v23, 1  ;;  %v4646_v36 = vsel %vm1651_vm10, %v1658_v24, %v1659_v25  ;;  %3795 = vmatprep.subr.bf16.mxu1 %v4207_v11  ;;  %v4649_v39 = vpop.f32.mrb[17].mxu0  ;;  %v656_v43 = vadd.f32 %v4536_v32, %v655_v58 }
 0x11c   : > { %v1240_v41 = vrot.slane %v1238_v28, 7  ;;  %v1441_v42 = vor.u32 %v1440_v31, %v1436_v18  ;;  %v667_v44 = vadd.f32 %v4072_v1, %v4536_v32  ;;  %v4656_v45 = vpop.f32.mrb[18].mxu0  ;;  %3910 = vmatpush3.bf16.msra.mxu0 %v4222_v21  ;;  %vm764_vm1 = vcmp.ge.f32.partialorder %v664_v38, 0.0  ;;  %v4215_v18 = vld [vmem:[%s5559_s5 + $0x160] sm:$0xff]  }
 0x11d   : > { %v800_v47 = vmul.f32 0.1, %v664_v38  ;;  %v659_v48 = vadd.f32 %v4536_v32, %v658_v5  ;;  %v1395_v49 = vsel %vm4546_vm7, %v4575_v37, 0  ;;  %v4665_v50 = vpop.f32.mrb[19].mxu0  ;;  %3911 = vmatprep.subr.bf16.mxu0 %v4225_v26  ;;  %vm762_vm2 = vcmp.ge.f32.partialorder %v656_v43, 0.0  ;;  %v4227_v37 = vld [vmem:[%s5559_s5 + $0x1e0] sm:$0xff]  }
 0x11e   : > { %v1243_v51 = vor.u32 %v1241_v29, %v1240_v41  ;;  %v4668_v52 = vsel %vm1410_vm13, %v1441_v42, %v1445_v35  ;;  %v798_v53 = vmul.f32 0.1, %v656_v43  ;;  %3796 = vmatpush3.bf16.msra.mxu1 %v4208_v27  ;;  %vm765_vm3 = vcmp.ge.f32.partialorder %v667_v44, 0.0  ;;  %v4230_v5 = vld [vmem:[%s5559_s5 + $0x1e8] sm:$0xff]   ;;  %v4216_v42 = vld [vmem:[%s5559_s5 + $0x120] sm:$0xff]  }
 0x11f   : > { %v836_v54 = vsel %vm764_vm1, %v664_v38, %v800_v47  ;;  %v801_v55 = vmul.f32 0.1, %v667_v44  ;;  %vm763_vm4 = vcmp.ge.f32.partialorder %v659_v48, 0.0  ;;  %3797 = vmatprep.subr.bf16.mxu1 %v4209_v40  ;;  %v799_v58 = vmul.f32 0.1, %v659_v48 }
 0x120   : > { %v834_v57 = vsel %vm762_vm2, %v656_v43, %v798_v53  ;;  %v1448_v59 = vshrl.u32 %v4609_v9, 16  ;;  %v1450_v60 = vshll.u32 %v4609_v9, 16  ;;  %3912 = vmatpush3.bf16.msra.mxu0 %v4226_v46  ;;  %v1455_v2 = vshll.u32 %v1395_v49, 16  ;;  %v4233_v43 = vld [vmem:[%s5559_s5 + $0x1f0] sm:$0xff]  }
 0x121   : > { %2378 = vmatmul.mubr.bf16.gmra.mrb[4].mxu1 %v4559_v20  ;;  %2547 = vmatmul.mubr.bf16.gmra.mrb[44].mxu0 %v4646_v36  ;;  %v837_v1 = vsel %vm765_vm3, %v667_v44, %v801_v55  ;;  %v4688_v3 = vsel %vm4546_vm7, 0, %v1243_v51  ;;  %v1661_v4 = vrot.slane %v4609_v9, 1  ;;  %v835_v20 = vsel %vm763_vm4, %v659_v48, %v799_v58  ;;  %v4234_v48 = vld [vmem:[%s5559_s5 + $0x1b0] sm:$0xff]   ;;  %v4235_v51 = vld [vmem:[%s5559_s5 + $0x1f8] sm:$0xff]  }
 0x122   : > { %2385 = vmatprep.mubr.bf16.mxu1 %v4668_v52  ;;  %v4695_v6 = vpack.c.bf16 %v837_v1, %v836_v54  ;;  %v1452_v7 = vrot.slane %v1450_v60, 1  ;;  %2554 = vmatprep.mubr.bf16.mxu0 %v4688_v3  ;;  %v1662_v10 = vrot.slane %v1395_v49, 1  ;;  %v4699_v12 = vpop.f32.mrb[20].mxu0  ;;  %v1197_v13 = vpack.c.bf16 %v835_v20, %v834_v57 }
 0x123   : > { %3798 = vmatpush3.bf16.msra.mxu1 %v4210_v56  ;;  %v4701_v14 = vpop.f32.mrb[21].mxu0  ;;  %3913 = vmatprep.subr.bf16.mxu0 %v4227_v37  ;;  %v4709_v16 = vsel %vm4546_vm7, %v1240_v41, 0  ;;  %v1457_v24 = vrot.slane %v1455_v2, 1  ;;  %v1462_v25 = vshll.u32 %v4688_v3, 16  ;;  %v4729_v27 = vsel %vm4546_vm7, 0, %v4642_v34 }
 0x124   : > { %v1259_v11 = vshrl.u32 %v4695_v6, 16  ;;  %v4711_v17 = vpop.f32.mrb[22].mxu0  ;;  %3799 = vmatprep.subr.bf16.mxu1 %v4211_v61  ;;  %3914 = vmatpush3.bf16.msra.mxu0 %v4228_v0  ;;  %v1252_v21 = vshrl.u32 %v1197_v13, 16  ;;  %v1453_v23 = vor.u32 %v1452_v7, %v1448_v59  ;;  %v1262_v28 = vshll.u32 %v4695_v6, 16  ;;  %v4220_v59 = vld [vmem:[%s5559_s5 + $0x128] sm:$0xff]  }
 0x125   : > { %v4720_v26 = vpop.f32.mrb[23].mxu0  ;;  %3915 = vmatprep.subr.bf16.mxu0 %v4230_v5  ;;  %v1255_v29 = vshll.u32 %v1197_v13, 16  ;;  %v4724_v31 = vsel %vm1651_vm10, %v1661_v4, %v1662_v10  ;;  %v1460_v38 = vshrl.u32 %v4688_v3, 16  ;;  %v1467_v40 = vshll.u32 %v4709_v16, 16  ;;  %v4236_v4 = vld [vmem:[%s5559_s5 + $0x1b8] sm:$0xff]  }
 0x126   : > { %v4731_v35 = vrot.slane %v1252_v21, 7  ;;  %v680_v41 = vadd.f32 %v4639_v33, %v4536_v32  ;;  %v4743_v34 = vrot.slane %v1259_v11, 7  ;;  %v1464_v44 = vrot.slane %v1462_v25, 1  ;;  %v4219_v33 = vld [vmem:[%s5559_s5 + $0x168] sm:$0xff]  }
 0x127   : > { %3800 = vmatpush3.bf16.msra.mxu1 %v4212_v15  ;;  %v672_v46 = vadd.f32 %v4536_v32, %v4649_v39  ;;  %v683_v47 = vadd.f32 %v4656_v45, %v4536_v32  ;;  %v4757_v49 = vsel %vm1410_vm13, %v1453_v23, %v1457_v24  ;;  %v1664_v39 = vrot.slane %v4688_v3, 1 }
 0x128   : > { %3801 = vmatprep.subr.bf16.mxu1 %v4215_v18  ;;  %3916 = vmatpush3.bf16.msra.mxu0 %v4232_v19  ;;  %v1665_v45 = vrot.slane %v4709_v16, 1  ;;  %vm768_vm5 = vcmp.ge.f32.partialorder %v680_v41, 0.0  ;;  %v804_v53 = vmul.f32 0.1, %v680_v41  ;;  %v1257_v55 = vor.u32 %v1255_v29, %v4731_v35  ;;  %v4224_v19 = vld [vmem:[%s5559_s5 + $0x130] sm:$0xff]  }
 0x129   : > { %2386 = vmatmul.mubr.bf16.gmra.mrb[8].mxu1 %v4595_v62  ;;  %2555 = vmatmul.mubr.bf16.gmra.mrb[48].mxu0 %v4724_v31  ;;  %vm766_vm6 = vcmp.ge.f32.partialorder %v672_v46, 0.0  ;;  %v802_v54 = vmul.f32 0.1, %v672_v46  ;;  %vm769_vm8 = vcmp.ge.f32.partialorder %v683_v47, 0.0  ;;  %v1469_v56 = vrot.slane %v1467_v40, 1 }
 0x12a   : > { %2393 = vmatprep.mubr.bf16.mxu1 %v4757_v49  ;;  %2562 = vmatprep.mubr.bf16.mxu0 %v4729_v27  ;;  %v805_v37 = vmul.f32 0.1, %v683_v47  ;;  %v675_v57 = vadd.f32 %v4536_v32, %v4665_v50  ;;  %v4770_v58 = vpop.f32.mrb[24].mxu0  ;;  %v1465_v60 = vor.u32 %v1464_v44, %v1460_v38  ;;  %v840_v61 = vsel %vm768_vm5, %v680_v41, %v804_v53  ;;  %v4223_v50 = vld [vmem:[%s5559_s5 + $0x170] sm:$0xff]  }
 0x12b   : > { %3802 = vmatpush3.bf16.msra.mxu1 %v4216_v42  ;;  %3917 = vmatprep.subr.bf16.mxu0 %v4233_v43  ;;  %v1397_v0 = vsel %vm4546_vm7, %v4624_v22, 0  ;;  %v1474_v1 = vshll.u32 %v4729_v27, 16  ;;  %v4780_v2 = vpop.f32.mrb[25].mxu0  ;;  %v838_v5 = vsel %vm766_vm6, %v672_v46, %v802_v54  ;;  %v1264_v7 = vor.u32 %v1262_v28, %v4743_v34  ;;  %v4229_v28 = vld [vmem:[%s5559_s5 + $0x178] sm:$0xff]   ;;  %v4844_v54 = vld [vmem:[%s5559_s5 + $0x200] sm:$0xff]  }
 0x12c   : > { %3803 = vmatprep.subr.bf16.mxu1 %v4219_v33  ;;  %3918 = vmatpush3.bf16.msra.mxu0 %v4234_v48  ;;  %v841_v6 = vsel %vm769_vm8, %v683_v47, %v805_v37  ;;  %vm767_vm9 = vcmp.ge.f32.partialorder %v675_v57, 0.0  ;;  %v803_v22 = vmul.f32 0.1, %v675_v57  ;;  %v4790_v20 = vpop.f32.mrb[26].mxu0  ;;  %v1472_v11 = vshrl.u32 %v4729_v27, 16  ;;  %v4231_v33 = vld [vmem:[%s5559_s5 + $0x138] sm:$0xff]  }
 0x12d   : > { %3919 = vmatprep.subr.bf16.mxu0 %v4235_v51  ;;  %v4793_v10 = vpack.c.bf16 %v841_v6, %v840_v61  ;;  %v4795_v13 = vpop.f32.mrb[27].mxu0  ;;  %v1476_v16 = vrot.slane %v1474_v1, 1  ;;  %v1479_v18 = vshll.u32 %v1397_v0, 16  ;;  %v4802_v21 = vsel %vm1651_vm10, %v1664_v39, %v1665_v45 }
 0x12e   : > { %v839_v15 = vsel %vm767_vm9, %v675_v57, %v803_v22  ;;  %v1667_v24 = vrot.slane %v4729_v27, 1  ;;  %v1668_v25 = vrot.slane %v1397_v0, 1  ;;  %v4810_v29 = vsel %vm1410_vm13, %v1465_v60, %v1469_v56 }
 0x12f   : > { %3804 = vmatpush3.bf16.msra.mxu1 %v4220_v59  ;;  %v1199_v23 = vpack.c.bf16 %v839_v15, %v838_v5  ;;  %v4815_v38 = vsel %vm4546_vm7, 0, %v1257_v55  ;;  %v1273_v42 = vshrl.u32 %v4793_v10, 16  ;;  %v1477_v43 = vor.u32 %v1476_v16, %v1472_v11 }
 0x130   : > { %3805 = vmatprep.subr.bf16.mxu1 %v4223_v50  ;;  %3920 = vmatpush3.bf16.msra.mxu0 %v4236_v4  ;;  %v1481_v44 = vrot.slane %v1479_v18, 1  ;;  %v4824_v46 = vsel %vm4546_vm7, 0, %v1264_v7  ;;  %v4832_v48 = vsel %vm1651_vm10, %v1667_v24, %v1668_v25  ;;  %v1486_v39 = vshll.u32 %v4815_v38, 16 }
 0x131   : > { %2394 = vmatmul.mubr.bf16.gmra.mrb[12].mxu1 %v4609_v9  ;;  %2563 = vmatmul.mubr.bf16.gmra.mrb[52].mxu0 %v4802_v21  ;;  %v1266_v40 = vshrl.u32 %v1199_v23, 16  ;;  %v696_v45 = vadd.f32 %v4699_v12, %v4536_v32  ;;  %v688_v51 = vadd.f32 %v4536_v32, %v4701_v14  ;;  %v1269_v56 = vshll.u32 %v1199_v23, 16 }
 0x132   : > { %2401 = vmatprep.mubr.bf16.mxu1 %v4810_v29  ;;  %2570 = vmatprep.mubr.bf16.mxu0 %v4815_v38  ;;  %v4819_v41 = vpop.f32.mrb[28].mxu0  ;;  %v1398_v37 = vsel %vm4546_vm7, %v4731_v35, 0  ;;  %v699_v12 = vadd.f32 %v4711_v17, %v4536_v32  ;;  %v1484_v14 = vshrl.u32 %v4815_v38, 16  ;;  %v4855_v60 = vsel %vm1410_vm13, %v1477_v43, %v1481_v44 }
 0x133   : > { %v4826_v47 = vpop.f32.mrb[29].mxu0  ;;  %3806 = vmatpush3.bf16.msra.mxu1 %v4224_v19  ;;  %v1268_v55 = vrot.slane %v1266_v40, 7  ;;  %vm772_vm11 = vcmp.ge.f32.partialorder %v696_v45, 0.0  ;;  %v808_v59 = vmul.f32 0.1, %v696_v45  ;;  %vm770_vm12 = vcmp.ge.f32.partialorder %v688_v51, 0.0 }
 0x134   : > { %v4839_v53 = vpop.f32.mrb[30].mxu0  ;;  %3807 = vmatprep.subr.bf16.mxu1 %v4229_v28  ;;  %v806_v61 = vmul.f32 0.1, %v688_v51  ;;  %vm773_vm14 = vcmp.ge.f32.partialorder %v699_v12, 0.0  ;;  %v809_v0 = vmul.f32 0.1, %v699_v12  ;;  %v691_v17 = vadd.f32 %v4536_v32, %v4720_v26 }
 0x135   : > { %v4851_v57 = vpop.f32.mrb[31].mxu0  ;;  %v1488_v1 = vrot.slane %v1486_v39, 1  ;;  %v1491_v50 = vshll.u32 %v1398_v37, 16  ;;  %v844_v35 = vsel %vm772_vm11, %v696_v45, %v808_v59  ;;  %v1271_v4 = vor.u32 %v1269_v56, %v1268_v55 }
 0x136   : > { %v842_v5 = vsel %vm770_vm12, %v688_v51, %v806_v61  ;;  %v845_v6 = vsel %vm773_vm14, %v699_v12, %v809_v0  ;;  %v4865_v22 = vsel %vm4546_vm7, %v4743_v34, 0  ;;  %vm771_vm15 = vcmp.ge.f32.partialorder %v691_v17, 0.0 }
 0x137   : > { %3808 = vmatpush3.bf16.msra.mxu1 %v4231_v33  ;;  %v4869_v7 = vpack.c.bf16 %v845_v6, %v844_v35  ;;  %v807_v26 = vmul.f32 0.1, %v691_v17  ;;  %v1498_v15 = vshll.u32 %v4824_v46, 16  ;;  %v4874_v16 = vrot.slane %v1273_v42, 7 }
 0x138   : > { %4093 = vmatprep.subr.bf16.mxu1 %v4844_v54  ;;  %v1276_v18 = vshll.u32 %v4793_v10, 16  ;;  %v1670_v19 = vrot.slane %v4815_v38, 1  ;;  %v1671_v34 = vrot.slane %v1398_v37, 1  ;;  %v1489_v24 = vor.u32 %v1488_v1, %v1484_v14 }
 0x139   : > { %2402 = vmatmul.mubr.bf16.gmra.mrb[16].mxu1 %v4688_v3  ;;  %2571 = vmatmul.mubr.bf16.gmra.mrb[56].mxu0 %v4832_v48  ;;  %v1493_v25 = vrot.slane %v1491_v50, 1  ;;  %v843_v28 = vsel %vm771_vm15, %v691_v17, %v807_v26  ;;  %v1503_v40 = vshll.u32 %v4865_v22, 16  ;;  %v1496_v42 = vshrl.u32 %v4824_v46, 16 }
 0x13a   : > { %2409 = vmatprep.mubr.bf16.mxu1 %v4855_v60  ;;  %2578 = vmatprep.mubr.bf16.mxu0 %v4824_v46  ;;  %v4872_v11 = vpop.f32.mrb[32].mxu0  ;;  %v1201_v44 = vpack.c.bf16 %v843_v28, %v842_v5  ;;  %v1500_v39 = vrot.slane %v1498_v15, 1  ;;  %v4888_v10 = vsel %vm4546_vm7, 0, %v1271_v4  ;;  %v1278_v45 = vor.u32 %v1276_v18, %v4874_v16 }
 0x13b   : > { %v4878_v23 = vpop.f32.mrb[33].mxu0  ;;  %v4892_v51 = vsel %vm1651_vm10, %v1670_v19, %v1671_v34  ;;  %v4895_v56 = vsel %vm1410_vm13, %v1489_v24, %v1493_v25  ;;  %v1505_v37 = vrot.slane %v1503_v40, 1  ;;  %v1673_v12 = vrot.slane %v4824_v46, 1 }
 0x13c   : > { %v4881_v43 = vpop.f32.mrb[34].mxu0  ;;  %v1400_v14 = vsel %vm4546_vm7, %v1268_v55, 0  ;;  %v1510_v59 = vshll.u32 %v4888_v10, 16  ;;  %v712_v61 = vadd.f32 %v4770_v58, %v4536_v32  ;;  %v704_v0 = vadd.f32 %v4536_v32, %v4780_v2 }
 0x13d   : > { %v4883_v33 = vpop.f32.mrb[35].mxu0  ;;  %v715_v1 = vadd.f32 %v4790_v20, %v4536_v32  ;;  %v1501_v50 = vor.u32 %v1500_v39, %v1496_v42  ;;  %v1674_v55 = vrot.slane %v4865_v22, 1  ;;  %v1508_v35 = vshrl.u32 %v4888_v10, 16 }
 0x13e   : > { %v707_v17 = vadd.f32 %v4536_v32, %v4795_v13  ;;  %v1280_v4 = vshrl.u32 %v1201_v44, 16  ;;  %vm776_vm0 = vcmp.ge.f32.partialorder %v712_v61, 0.0  ;;  %v812_v58 = vmul.f32 0.1, %v712_v61 }
 0x13f   : > { %vm774_vm1 = vcmp.ge.f32.partialorder %v704_v0, 0.0  ;;  %v1515_v2 = vshll.u32 %v1400_v14, 16  ;;  %v810_v5 = vmul.f32 0.1, %v704_v0  ;;  %vm777_vm2 = vcmp.ge.f32.partialorder %v715_v1, 0.0 }
 0x140   : > { %v813_v20 = vmul.f32 0.1, %v715_v1  ;;  %v1512_v6 = vrot.slane %v1510_v59, 1  ;;  %v848_v26 = vsel %vm776_vm0, %v712_v61, %v812_v58  ;;  %vm775_vm3 = vcmp.ge.f32.partialorder %v707_v17, 0.0 }
 0x141   : > { %2410 = vmatmul.mubr.bf16.gmra.mrb[20].mxu1 %v4729_v27  ;;  %2579 = vmatmul.mubr.bf16.gmra.mrb[60].mxu0 %v4892_v51  ;;  %v811_v15 = vmul.f32 0.1, %v707_v17  ;;  %v1287_v18 = vshrl.u32 %v4869_v7, 16  ;;  %v846_v22 = vsel %vm774_vm1, %v704_v0, %v810_v5  ;;  %v1282_v34 = vrot.slane %v1280_v4, 7 }
 0x142   : > { %2417 = vmatprep.mubr.bf16.mxu1 %v4895_v56  ;;  %2586 = vmatprep.mubr.bf16.mxu0 %v4888_v10  ;;  %v849_v19 = vsel %vm777_vm2, %v715_v1, %v813_v20  ;;  %v1283_v24 = vshll.u32 %v1201_v44, 16  ;;  %v4919_v28 = vsel %vm1410_vm13, %v1501_v50, %v1505_v37  ;;  %v4922_v40 = vsel %vm1651_vm10, %v1673_v12, %v1674_v55 }
 0x143   : > { %v4916_v25 = vpack.c.bf16 %v849_v19, %v848_v26  ;;  %v847_v13 = vsel %vm775_vm3, %v707_v17, %v811_v15  ;;  %v4926_v42 = vsel %vm4546_vm7, 0, %v1278_v45  ;;  %v1513_v44 = vor.u32 %v1512_v6, %v1508_v35 }
 0x144   : > { %v4928_v39 = vpack.c.bf16 %v847_v13, %v846_v22  ;;  %v1517_v59 = vrot.slane %v1515_v2, 1  ;;  %v1676_v61 = vrot.slane %v4888_v10, 1  ;;  %v1677_v0 = vrot.slane %v1400_v14, 1 }
 0x145   : > { %v1285_v37 = vor.u32 %v1283_v24, %v1282_v34  ;;  %v1401_v45 = vsel %vm4546_vm7, %v4874_v16, 0  ;;  %v1289_v12 = vrot.slane %v1287_v18, 7  ;;  %v1290_v1 = vshll.u32 %v4869_v7, 16 }
 0x146   : > { %v4940_v50 = vsel %vm1410_vm13, %v1513_v44, %v1517_v59  ;;  %v4943_v55 = vsel %vm1651_vm10, %v1676_v61, %v1677_v0  ;;  %v1522_v14 = vshll.u32 %v4926_v42, 16  ;;  %v728_v35 = vadd.f32 %v4819_v41, %v4536_v32 }
 0x147   : > { %v1520_v17 = vshrl.u32 %v4926_v42, 16  ;;  %v1527_v4 = vshll.u32 %v1401_v45, 16  ;;  %v720_v16 = vadd.f32 %v4536_v32, %v4826_v47  ;;  %v731_v7 = vadd.f32 %v4839_v53, %v4536_v32 }
 0x148   : > { %v4955_v58 = vsel %vm4546_vm7, 0, %v1285_v37  ;;  %vm780_vm4 = vcmp.ge.f32.partialorder %v728_v35, 0.0  ;;  %v816_v2 = vmul.f32 0.1, %v728_v35  ;;  %v723_v5 = vadd.f32 %v4536_v32, %v4851_v57 }
 0x149   : > { %2418 = vmatmul.mubr.bf16.gmra.mrb[24].mxu1 %v4815_v38  ;;  %2587 = vmatmul.mubr.bf16.gmra.mrb[64].mxu0 %v4922_v40  ;;  %vm778_vm5 = vcmp.ge.f32.partialorder %v720_v16, 0.0  ;;  %v814_v41 = vmul.f32 0.1, %v720_v16  ;;  %vm781_vm6 = vcmp.ge.f32.partialorder %v731_v7, 0.0  ;;  %v817_v20 = vmul.f32 0.1, %v731_v7 }
 0x14a   : > { %2425 = vmatprep.mubr.bf16.mxu1 %v4919_v28  ;;  %2594 = vmatprep.mubr.bf16.mxu0 %v4926_v42  ;;  %v1524_v47 = vrot.slane %v1522_v14, 1  ;;  %v852_v6 = vsel %vm780_vm4, %v728_v35, %v816_v2  ;;  %vm779_vm8 = vcmp.ge.f32.partialorder %v723_v5, 0.0  ;;  %v815_v53 = vmul.f32 0.1, %v723_v5 }
 0x14b   : > { %v850_v26 = vsel %vm778_vm5, %v720_v16, %v814_v41  ;;  %v853_v15 = vsel %vm781_vm6, %v731_v7, %v817_v20  ;;  %v1679_v57 = vrot.slane %v4926_v42, 1  ;;  %v1534_v18 = vshll.u32 %v4955_v58, 16 }
 0x14c   : > { %v4965_v22 = vpack.c.bf16 %v853_v15, %v852_v6  ;;  %v851_v19 = vsel %vm779_vm8, %v723_v5, %v815_v53  ;;  %v1294_v24 = vshrl.u32 %v4928_v39, 16  ;;  %v1680_v13 = vrot.slane %v1401_v45, 1 }
 0x14d   : > { %v1402_v44 = vsel %vm4546_vm7, %v1282_v34, 0  ;;  %v4970_v59 = vpack.c.bf16 %v851_v19, %v850_v26  ;;  %v1292_v61 = vor.u32 %v1290_v1, %v1289_v12  ;;  %v1525_v0 = vor.u32 %v1524_v47, %v1520_v17 }
 0x14e   : > { %v1529_v37 = vrot.slane %v1527_v4, 1  ;;  %v1532_v14 = vshrl.u32 %v4955_v58, 16  ;;  %v1536_v35 = vrot.slane %v1534_v18, 1  ;;  %v1539_v16 = vshll.u32 %v1402_v44, 16 }
 0x14f   : > { %v1296_v7 = vrot.slane %v1294_v24, 7  ;;  %v1297_v2 = vshll.u32 %v4928_v39, 16  ;;  %v4975_v5 = vsel %vm1651_vm10, %v1679_v57, %v1680_v13  ;;  %v1301_v45 = vshrl.u32 %v4916_v25, 16 }
 0x150   : > { %v4980_v34 = vsel %vm1410_vm13, %v1525_v0, %v1529_v37  ;;  %v4985_v1 = vsel %vm4546_vm7, 0, %v1292_v61  ;;  %v744_v17 = vadd.f32 %v4872_v11, %v4536_v32  ;;  %v1682_v39 = vrot.slane %v4955_v58, 1 }
 0x151   : > { %2426 = vmatmul.mubr.bf16.gmra.mrb[28].mxu1 %v4824_v46  ;;  %2595 = vmatmul.mubr.bf16.gmra.mrb[68].mxu0 %v4943_v55  ;;  %v1683_v4 = vrot.slane %v1402_v44, 1  ;;  %v736_v41 = vadd.f32 %v4536_v32, %v4878_v23  ;;  %v1537_v20 = vor.u32 %v1536_v35, %v1532_v14  ;;  %v1541_v47 = vrot.slane %v1539_v16, 1 }
 0x152   : > { %2433 = vmatprep.mubr.bf16.mxu1 %v4940_v50  ;;  %2602 = vmatprep.mubr.bf16.mxu0 %v4955_v58  ;;  %vm784_vm9 = vcmp.ge.f32.partialorder %v744_v17, 0.0  ;;  %v820_v6 = vmul.f32 0.1, %v744_v17  ;;  %v1299_v53 = vor.u32 %v1297_v2, %v1296_v7  ;;  %v1403_v26 = vsel %vm4546_vm7, %v1289_v12, 0 }
 0x153   : > { %v1546_v11 = vshll.u32 %v4985_v1, 16  ;;  %v1303_v15 = vrot.slane %v1301_v45, 7  ;;  %v1304_v57 = vshll.u32 %v4916_v25, 16  ;;  %v818_v18 = vmul.f32 0.1, %v736_v41 }
 0x154   : > { %v4999_v19 = vsel %vm1651_vm10, %v1682_v39, %v1683_v4  ;;  %v856_v24 = vsel %vm784_vm9, %v744_v17, %v820_v6  ;;  %vm782_vm11 = vcmp.ge.f32.partialorder %v736_v41, 0.0  ;;  %v747_v23 = vadd.f32 %v4881_v43, %v4536_v32 }
 0x155   : > { %v5004_v13 = vsel %vm1410_vm13, %v1537_v20, %v1541_v47  ;;  %v1544_v44 = vshrl.u32 %v4985_v1, 16  ;;  %v1551_v12 = vshll.u32 %v1403_v26, 16  ;;  %v739_v61 = vadd.f32 %v4536_v32, %v4883_v33 }
 0x156   : > { %v1548_v0 = vrot.slane %v1546_v11, 1  ;;  %v5011_v25 = vsel %vm4546_vm7, 0, %v1299_v53  ;;  %vm785_vm12 = vcmp.ge.f32.partialorder %v747_v23, 0.0  ;;  %v821_v37 = vmul.f32 0.1, %v747_v23 }
 0x157   : > { %v1189_v43 = vmul.f32 0.0, %v856_v24  ;;  %v854_v14 = vsel %vm782_vm11, %v736_v41, %v818_v18  ;;  %vm783_vm14 = vcmp.ge.f32.partialorder %v739_v61, 0.0  ;;  %v819_v35 = vmul.f32 0.1, %v739_v61 }
 0x158   : > { %v857_v32 = vsel %vm785_vm12, %v747_v23, %v821_v37  ;;  %v1306_v33 = vor.u32 %v1304_v57, %v1303_v15  ;;  %v1553_v45 = vrot.slane %v1551_v12, 1  ;;  %v1685_v17 = vrot.slane %v4985_v1, 1 }
 0x159   : > { %2434 = vmatmul.mubr.bf16.gmra.mrb[32].mxu1 %v4888_v10  ;;  %2603 = vmatmul.mubr.bf16.gmra.mrb[72].mxu0 %v4975_v5  ;;  %v1190_v16 = vmul.f32 0.0, %v857_v32  ;;  %v855_v2 = vsel %vm783_vm14, %v739_v61, %v819_v35  ;;  %v1686_v39 = vrot.slane %v1403_v26, 1  ;;  %v1308_v20 = vshrl.u32 %v4970_v59, 16 }
 0x15a   : > { %2441 = vmatprep.mubr.bf16.mxu1 %v4980_v34  ;;  %2610 = vmatprep.mubr.bf16.mxu0 %v4985_v1  ;;  %v1207_v4 = vpack.c.bf16 %v855_v2, %v854_v14  ;;  %v1549_v47 = vor.u32 %v1548_v0, %v1544_v44  ;;  %v1558_v41 = vshll.u32 %v5011_v25, 16  ;;  %v1404_v53 = vsel %vm4546_vm7, %v1296_v7, 0 }
 0x15b   : > { %v5020_v6 = vpack.c.bf16 %v1190_v16, %v1189_v43  ;;  %v1311_v11 = vshll.u32 %v4970_v59, 16  ;;  %v5026_v57 = vsel %vm1651_vm10, %v1685_v17, %v1686_v39  ;;  %v5030_v18 = vsel %vm4546_vm7, 0, %v1306_v33 }
 0x15c   : > { %v1556_v26 = vshrl.u32 %v5011_v25, 16  ;;  %v1310_v24 = vrot.slane %v1308_v20, 7  ;;  %v5035_v23 = vsel %vm1410_vm13, %v1549_v47, %v1553_v45  ;;  %v1560_v7 = vrot.slane %v1558_v41, 1 }
 0x15d   : > { %v1563_v44 = vshll.u32 %v1404_v53, 16  ;;  %v1315_v59 = vshrl.u32 %v4965_v22, 16  ;;  %v1688_v12 = vrot.slane %v5011_v25, 1  ;;  %v1689_v61 = vrot.slane %v1404_v53, 1 }
 0x15e   : > { %v1313_v0 = vor.u32 %v1311_v11, %v1310_v24  ;;  %v1561_v37 = vor.u32 %v1560_v7, %v1556_v26  ;;  %v1570_v14 = vshll.u32 %v5030_v18, 16  ;;  %v1405_v35 = vsel %vm4546_vm7, %v1303_v15, 0 }
 0x15f   : > { %v1565_v43 = vrot.slane %v1563_v44, 1  ;;  %v1317_v32 = vrot.slane %v1315_v59, 7  ;;  %v1318_v33 = vshll.u32 %v4965_v22, 16  ;;  %v5047_v16 = vsel %vm1651_vm10, %v1688_v12, %v1689_v61 }
 0x160   : > { %v1568_v2 = vshrl.u32 %v5030_v18, 16  ;;  %v1572_v17 = vrot.slane %v1570_v14, 1  ;;  %v1575_v39 = vshll.u32 %v1405_v35, 16  ;;  %v5057_v15 = vsel %vm4546_vm7, 0, %v1313_v0 }
 0x161   : > { %2442 = vmatmul.mubr.bf16.gmra.mrb[36].mxu1 %v4926_v42  ;;  %2611 = vmatmul.mubr.bf16.gmra.mrb[76].mxu0 %v4999_v19  ;;  %v5052_v45 = vsel %vm1410_vm13, %v1561_v37, %v1565_v43  ;;  %v1322_v22 = vshrl.u32 %v1207_v4, 16  ;;  %v1320_v20 = vor.u32 %v1318_v33, %v1317_v32  ;;  %v1691_v47 = vrot.slane %v5030_v18, 1 }
 0x162   : > { %2449 = vmatprep.mubr.bf16.mxu1 %v5004_v13  ;;  %2618 = vmatprep.mubr.bf16.mxu0 %v5011_v25  ;;  %v1692_v41 = vrot.slane %v1405_v35, 1  ;;  %v1573_v53 = vor.u32 %v1572_v17, %v1568_v2  ;;  %v1577_v11 = vrot.slane %v1575_v39, 1  ;;  %v1582_v26 = vshll.u32 %v5057_v15, 16 }
 0x163   : > { %v1406_v7 = vsel %vm4546_vm7, %v1310_v24, 0  ;;  %v5065_v44 = vrot.slane %v1322_v22, 7  ;;  %v1325_v59 = vshll.u32 %v1207_v4, 16  ;;  %v5072_v61 = vsel %vm4546_vm7, 0, %v1320_v20 }
 0x164   : > { %v5068_v12 = vsel %vm1651_vm10, %v1691_v47, %v1692_v41  ;;  %v5076_v0 = vsel %vm1410_vm13, %v1573_v53, %v1577_v11  ;;  %v1580_v37 = vshrl.u32 %v5057_v15, 16  ;;  %v1584_v24 = vrot.slane %v1582_v26, 1 }
 0x165   : > { %v1587_v43 = vshll.u32 %v1406_v7, 16  ;;  %v1327_v4 = vor.u32 %v1325_v59, %v5065_v44  ;;  %v1694_v14 = vrot.slane %v5057_v15, 1  ;;  %v1695_v35 = vrot.slane %v1406_v7, 1 }
 0x166   : > { %v1585_v33 = vor.u32 %v1584_v24, %v1580_v37  ;;  %v1594_v17 = vshll.u32 %v5072_v61, 16  ;;  %v1407_v39 = vsel %vm4546_vm7, %v1317_v32, 0  ;;  %v1592_v41 = vshrl.u32 %v5072_v61, 16 }
 0x167   : > { %v1589_v2 = vrot.slane %v1587_v43, 1  ;;  %v5089_v22 = vsel %vm4546_vm7, 0, %v1327_v4  ;;  %v5092_v20 = vsel %vm1651_vm10, %v1694_v14, %v1695_v35  ;;  %v1599_v11 = vshll.u32 %v1407_v39, 16  ;;  %v4238_v43 = vld [vmem:[%s5559_s5 + $0x208] sm:$0xff]  }
 0x168   : > { %v1596_v53 = vrot.slane %v1594_v17, 1  ;;  %v1697_v32 = vrot.slane %v5072_v61, 1  ;;  %v1698_v26 = vrot.slane %v1407_v39, 1  ;;  %v1717_v39 = vshrl.u32 %v5089_v22, 16 }
 0x169   : > { %2450 = vmatmul.mubr.bf16.gmra.mrb[40].mxu1 %v4955_v58  ;;  %2619 = vmatmul.mubr.bf16.gmra.mrb[80].mxu0 %v5026_v57  ;;  %v5096_v47 = vsel %vm1410_vm13, %v1585_v33, %v1589_v2  ;;  %v1601_v59 = vrot.slane %v1599_v11, 1 }
 0x16a   : > { %2457 = vmatprep.mubr.bf16.mxu1 %v5035_v23  ;;  %2626 = vmatprep.mubr.bf16.mxu0 %v5030_v18  ;;  %v1597_v7 = vor.u32 %v1596_v53, %v1592_v41  ;;  %v5104_v37 = vsel %vm1651_vm10, %v1697_v32, %v1698_v26 }
 0x16c   : > { %v5108_v24 = vsel %vm1410_vm13, %v1597_v7, %v1601_v59 }
 0x171   : > { %2458 = vmatmul.mubr.bf16.gmra.mrb[44].mxu1 %v4985_v1  ;;  %2627 = vmatmul.mubr.bf16.gmra.mrb[84].mxu0 %v5047_v16 }
 0x172   : > { %2465 = vmatprep.mubr.bf16.mxu1 %v5052_v45  ;;  %2634 = vmatprep.mubr.bf16.mxu0 %v5057_v15 }
 0x179   : > { %2466 = vmatmul.mubr.bf16.gmra.mrb[48].mxu1 %v5011_v25  ;;  %2635 = vmatmul.mubr.bf16.gmra.mrb[88].mxu0 %v5068_v12 }
 0x17a   : > { %2473 = vmatprep.mubr.bf16.mxu1 %v5076_v0  ;;  %2642 = vmatprep.mubr.bf16.mxu0 %v5072_v61 }
 0x181   : > { %2474 = vmatmul.mubr.bf16.gmra.mrb[52].mxu1 %v5030_v18  ;;  %2643 = vmatmul.mubr.bf16.gmra.mrb[92].mxu0 %v5092_v20 }
 0x182   : > { %2481 = vmatprep.mubr.bf16.mxu1 %v5096_v47  ;;  %2650 = vmatprep.mubr.bf16.mxu0 %v5089_v22 }
 0x189   : > { %2482 = vmatmul.mubr.bf16.gmra.mrb[56].mxu1 %v5057_v15  ;;  %2651 = vmatmul.mubr.bf16.gmra.mrb[96].mxu0 %v5104_v37 }
 0x18a   : > { %2489 = vmatprep.mubr.bf16.mxu1 %v5108_v24  ;;  %2852 = vmatprep.mubr.bf16.mxu0 %v4668_v52 }
 0x191   : > { %2490 = vmatmul.mubr.bf16.gmra.mrb[60].mxu1 %v5072_v61  ;;  %2853 = vmatmul.mubr.bf16.vlgmr.msra.gmra.mrb[100].mxu0 %v4595_v62  ;;  %v4239_v62 = vld [vmem:[%s5559_s5 + $0x210] sm:$0xff]  }
 0x192   : > { %2691 = vmatprep.mubr.bf16.mxu1 %v4605_v8  ;;  %2860 = vmatprep.mubr.bf16.mxu0 %v4757_v49  ;;  %v4240_v8 = vld [vmem:[%s5559_s5 + $0x218] sm:$0xff]  }
 0x199   : > { %2692 = vmatmul.mubr.bf16.vlgmr.msra.gmra.mrb[64].mxu1 %v4633_v30  ;;  %2861 = vmatmul.mubr.bf16.gmra.mrb[104].mxu0 %v4609_v9  ;;  %v4241_v9 = vld [vmem:[%s5559_s5 + $0x220] sm:$0xff]   ;;  %v4242_v30 = vld [vmem:[%s5559_s5 + $0x228] sm:$0xff]  }
 0x19a   : > { %4094 = vmatpush3.bf16.msra.mxu1 %v4844_v54  ;;  %2699 = vmatprep.mubr.bf16.mxu1 %v4646_v36 }
 0x19b   : > { %2868 = vmatprep.mubr.bf16.mxu0 %v4810_v29  ;;  %4095 = vmatprep.subr.bf16.mxu1 %v4238_v43 }
 0x19e   : > { %4096 = vmatpush3.bf16.msra.mxu1 %v4238_v43 }
 0x19f   : > { %4097 = vmatprep.subr.bf16.mxu1 %v4239_v62 }
 0x1a1   : > { %2700 = vmatmul.mubr.bf16.gmra.mrb[68].mxu1 %v4668_v52  ;;  %2869 = vmatmul.mubr.bf16.gmra.mrb[108].mxu0 %v4688_v3  ;;  %v4243_v52 = vld [vmem:[%s5559_s5 + $0x230] sm:$0xff]   ;;  %v4244_v3 = vld [vmem:[%s5559_s5 + $0x238] sm:$0xff]  }
 0x1a2   : > { %2707 = vmatprep.mubr.bf16.mxu1 %v4724_v31  ;;  %2876 = vmatprep.mubr.bf16.mxu0 %v4855_v60 }
 0x1a3   : > { %4098 = vmatpush3.bf16.msra.mxu1 %v4239_v62 }
 0x1a4   : > { %4099 = vmatprep.subr.bf16.mxu1 %v4240_v8 }
 0x1a7   : > { %4100 = vmatpush3.bf16.msra.mxu1 %v4240_v8 }
 0x1a8   : > { %4101 = vmatprep.subr.bf16.mxu1 %v4241_v9 }
 0x1a9   : > { %2708 = vmatmul.mubr.bf16.gmra.mrb[72].mxu1 %v4757_v49  ;;  %2877 = vmatmul.mubr.bf16.gmra.mrb[112].mxu0 %v4729_v27 }
 0x1aa   : > { %2715 = vmatprep.mubr.bf16.mxu1 %v4802_v21  ;;  %2884 = vmatprep.mubr.bf16.mxu0 %v4895_v56 }
 0x1ab   : > { %4102 = vmatpush3.bf16.msra.mxu1 %v4241_v9 }
 0x1ac   : > { %4103 = vmatprep.subr.bf16.mxu1 %v4242_v30 }
 0x1af   : > { %4104 = vmatpush3.bf16.msra.mxu1 %v4242_v30 }
 0x1b0   : > { %4105 = vmatprep.subr.bf16.mxu1 %v4243_v52 }
 0x1b1   : > { %2716 = vmatmul.mubr.bf16.gmra.mrb[76].mxu1 %v4810_v29  ;;  %2885 = vmatmul.mubr.bf16.gmra.mrb[116].mxu0 %v4815_v38  ;;  %v1329_v29 = vshrl.u32 %v5020_v6, 16 }
 0x1b2   : > { %2723 = vmatprep.mubr.bf16.mxu1 %v4832_v48  ;;  %2892 = vmatprep.mubr.bf16.mxu0 %v4919_v28 }
 0x1b3   : > { %4106 = vmatpush3.bf16.msra.mxu1 %v4243_v52 }
 0x1b4   : > { %4107 = vmatprep.subr.bf16.mxu1 %v4244_v3 }
 0x1b7   : > { %4108 = vmatpush3.bf16.msra.mxu1 %v4244_v3 }
 0x1b9   : > { %2724 = vmatmul.mubr.bf16.gmra.mrb[80].mxu1 %v4855_v60  ;;  %2893 = vmatmul.mubr.bf16.gmra.mrb[120].mxu0 %v4824_v46 }
 0x1ba   : > { %2731 = vmatprep.mubr.bf16.mxu1 %v4892_v51  ;;  %2900 = vmatprep.mubr.bf16.mxu0 %v4940_v50 }
 0x1c1   : > { %2732 = vmatmul.mubr.bf16.gmra.mrb[84].mxu1 %v4895_v56  ;;  %2901 = vmatmul.mubr.bf16.gmra.mrb[124].mxu0 %v4888_v10  ;;  %v1332_v10 = vshll.u32 %v5020_v6, 16  ;;  %v1331_v56 = vrot.slane %v1329_v29, 7 }
 0x1c2   : > { %2739 = vmatprep.mubr.bf16.mxu1 %v4922_v40  ;;  %2908 = vmatprep.mubr.bf16.mxu0 %v4980_v34 }
 0x1c3   : > { %v1334_v4 = vor.u32 %v1332_v10, %v1331_v56 }
 0x1c9   : > { %2740 = vmatmul.mubr.bf16.gmra.mrb[88].mxu1 %v4919_v28  ;;  %2909 = vmatmul.mubr.bf16.gmra.mrb[128].mxu0 %v4926_v42 }
 0x1ca   : > { %2747 = vmatprep.mubr.bf16.mxu1 %v4943_v55  ;;  %2916 = vmatprep.mubr.bf16.mxu0 %v5004_v13 }
 0x1d1   : > { %2748 = vmatmul.mubr.bf16.gmra.mrb[92].mxu1 %v4940_v50  ;;  %2917 = vmatmul.mubr.bf16.gmra.mrb[132].mxu0 %v4955_v58  ;;  %v5188_v50 = vld [vmem:[%s5560_s6] ss:$0 sm:$0xff] }
 0x1d2   : > { %2755 = vmatprep.mubr.bf16.mxu1 %v4975_v5  ;;  %2924 = vmatprep.mubr.bf16.mxu0 %v5035_v23 }
 0x1d9   : > { %2756 = vmatmul.mubr.bf16.gmra.mrb[96].mxu1 %v4980_v34  ;;  %2925 = vmatmul.mubr.bf16.gmra.mrb[136].mxu0 %v4985_v1  ;;  %v1719_v1 = vshll.u32 %v5089_v22, 16 }
 0x1da   : > { %2763 = vmatprep.mubr.bf16.mxu1 %v4999_v19  ;;  %2932 = vmatprep.mubr.bf16.mxu0 %v5052_v45 }
 0x1db   : > { %v1721_v41 = vrot.slane %v1719_v1, 1 }
 0x1dd   : > { %v1722_v43 = vor.u32 %v1721_v41, %v1717_v39 }
 0x1e1   : > { %2764 = vmatmul.mubr.bf16.gmra.mrb[100].mxu1 %v5004_v13  ;;  %2933 = vmatmul.mubr.bf16.gmra.mrb[140].mxu0 %v5011_v25 }
 0x1e2   : > { %2771 = vmatprep.mubr.bf16.mxu1 %v5026_v57  ;;  %2940 = vmatprep.mubr.bf16.mxu0 %v5076_v0 }
 0x1e4   : > { %v3697_v27 = vpop.f32.mrb[36].mxu0 }
 0x1e5   : > { %v3698_v49 = vpop.f32.mrb[37].mxu0 }
 0x1e6   : > { %v3699_v38 = vadd.f32 %v3698_v49, %v3697_v27  ;;  %v3700_v46 = vpop.f32.mrb[38].mxu0  ;;  %v5215_v27 = vsel %vm4546_vm7, %v1331_v56, 0 }
 0x1e7   : > { %v3701_v54 = vpop.f32.mrb[39].mxu0  ;;  %v1743_v63 = vshll.u32 %v5215_v27, 16 }
 0x1e8   : > { %v3702_v60 = vadd.f32 %v3701_v54, %v3700_v46 }
 0x1e9   : > { %2772 = vmatmul.mubr.bf16.gmra.mrb[104].mxu1 %v5035_v23  ;;  %2941 = vmatmul.mubr.bf16.gmra.mrb[144].mxu0 %v5030_v18  ;;  %v5194_v23 = vsel %vm4546_vm7, %v5065_v44, 0  ;;  %v5206_v44 = vsel %vm4546_vm7, 0, %v1334_v4 }
 0x1ea   : > { %2779 = vmatprep.mubr.bf16.mxu1 %v5047_v16  ;;  %2948 = vmatprep.mubr.bf16.mxu0 %v5096_v47  ;;  %v1724_v53 = vshll.u32 %v5194_v23, 16  ;;  %v1738_v8 = vshll.u32 %v5206_v44, 16  ;;  %v1736_v10 = vshrl.u32 %v5206_v44, 16 }
 0x1ec   : > { %v3585_v28 = vpop.f32.mrb[0].mxu1  ;;  %v3703_v42 = vpop.f32.mrb[40].mxu0  ;;  %v1726_v62 = vrot.slane %v1724_v53, 1 }
 0x1ed   : > { %v3586_v58 = vpop.f32.mrb[1].mxu1  ;;  %v3704_v34 = vpop.f32.mrb[41].mxu0 }
 0x1ee   : > { %v3587_v13 = vadd.f32 %v3586_v58, %v3585_v28  ;;  %v3588_v25 = vpop.f32.mrb[2].mxu1  ;;  %v3705_v18 = vadd.f32 %v3704_v34, %v3703_v42  ;;  %v3706_v6 = vpop.f32.mrb[42].mxu0  ;;  %v1740_v28 = vrot.slane %v1738_v8, 1 }
 0x1ef   : > { %v3589_v14 = vpop.f32.mrb[3].mxu1  ;;  %v3707_v35 = vpop.f32.mrb[43].mxu0 }
 0x1f0   : > { %v2372_v33 = vadd.f32 %v3587_v13, %v5188_v50  ;;  %v3590_v2 = vadd.f32 %v3589_v14, %v3588_v25  ;;  %v3708_v17 = vadd.f32 %v3707_v35, %v3706_v6  ;;  %v1741_v13 = vor.u32 %v1740_v28, %v1736_v10 }
 0x1f1   : > { %2780 = vmatmul.mubr.bf16.gmra.mrb[108].mxu1 %v5052_v45  ;;  %2949 = vmatmul.mubr.bf16.gmra.mrb[148].mxu0 %v5057_v15  ;;  %v1745_v25 = vrot.slane %v1743_v63, 1 }
 0x1f2   : > { %v2375_v11 = vadd.f32 %v3590_v2, %v5188_v50  ;;  %2787 = vmatprep.mubr.bf16.mxu1 %v5068_v12  ;;  %2956 = vmatprep.mubr.bf16.mxu0 %v5108_v24  ;;  %v5208_v32 = vadd.f32 %v3699_v38, %v2372_v33 }
 0x1f4   : > { %v3591_v45 = vpop.f32.mrb[4].mxu1  ;;  %v3709_v26 = vpop.f32.mrb[44].mxu0  ;;  %v5210_v15 = vadd.f32 %v3702_v60, %v2375_v11  ;;  %v5221_v60 = vsel %vm1410_vm13, %v1722_v43, %v1726_v62  ;;  %v1731_v62 = vrot.slane %v5089_v22, 1 }
 0x1f5   : > { %v3592_v7 = vpop.f32.mrb[5].mxu1  ;;  %v3710_v59 = vpop.f32.mrb[45].mxu0 }
 0x1f6   : > { %v3593_v9 = vadd.f32 %v3592_v7, %v3591_v45  ;;  %v3594_v30 = vpop.f32.mrb[6].mxu1  ;;  %v3711_v52 = vadd.f32 %v3710_v59, %v3709_v26  ;;  %v3712_v3 = vpop.f32.mrb[46].mxu0 }
 0x1f7   : > { %v3595_v49 = vpop.f32.mrb[7].mxu1  ;;  %v3713_v29 = vpop.f32.mrb[47].mxu0 }
 0x1f8   : > { %v2380_v38 = vadd.f32 %v3593_v9, %v5188_v50  ;;  %v3596_v46 = vadd.f32 %v3595_v49, %v3594_v30  ;;  %v3714_v54 = vadd.f32 %v3713_v29, %v3712_v3 }
 0x1f9   : > { %2788 = vmatmul.mubr.bf16.gmra.mrb[112].mxu1 %v5076_v0  ;;  %2957 = vmatmul.mubr.bf16.gmra.mrb[152].mxu0 %v5072_v61 }
 0x1fa   : > { %v2383_v56 = vadd.f32 %v3596_v46, %v5188_v50  ;;  %2795 = vmatprep.mubr.bf16.mxu1 %v5092_v20  ;;  %2964 = vmatprep.mubr.bf16.mxu0 %v5221_v60  ;;  %v5228_v42 = vadd.f32 %v3705_v18, %v2380_v38  ;;  %v1746_v18 = vsel %vm1410_vm13, %v1741_v13, %v1745_v25 }
 0x1fc   : > { %v3597_v58 = vpop.f32.mrb[8].mxu1  ;;  %v3715_v0 = vpop.f32.mrb[48].mxu0  ;;  %v5230_v34 = vadd.f32 %v3708_v17, %v2383_v56 }
 0x1fd   : > { %v3598_v61 = vpop.f32.mrb[9].mxu1  ;;  %v3716_v1 = vpop.f32.mrb[49].mxu0 }
 0x1fe   : > { %v3599_v6 = vadd.f32 %v3598_v61, %v3597_v58  ;;  %v3600_v4 = vpop.f32.mrb[10].mxu1  ;;  %v3717_v14 = vadd.f32 %v3716_v1, %v3715_v0  ;;  %v3718_v35 = vpop.f32.mrb[50].mxu0 }
 0x1ff   : > { %v3601_v33 = vpop.f32.mrb[11].mxu1  ;;  %v3719_v2 = vpop.f32.mrb[51].mxu0 }
 0x200   : > { %v2388_v39 = vadd.f32 %v3599_v6, %v5188_v50  ;;  %v3602_v41 = vadd.f32 %v3601_v33, %v3600_v4  ;;  %v3720_v53 = vadd.f32 %v3719_v2, %v3718_v35 }
 0x201   : > { %2796 = vmatmul.mubr.bf16.gmra.mrb[116].mxu1 %v5096_v47  ;;  %2965 = vmatmul.mubr.bf16.gmra.mrb[156].mxu0 %v5089_v22  ;;  %v1732_v47 = vrot.slane %v5194_v23, 1 }
 0x202   : > { %v2391_v17 = vadd.f32 %v3602_v41, %v5188_v50  ;;  %2803 = vmatprep.mubr.bf16.mxu1 %v5104_v37  ;;  %2972 = vmatprep.mubr.bf16.mxu0 %v1746_v18  ;;  %v5238_v11 = vadd.f32 %v3711_v52, %v2388_v39 }
 0x204   : > { %v3603_v45 = vpop.f32.mrb[12].mxu1  ;;  %v3721_v26 = vpop.f32.mrb[52].mxu0  ;;  %v5240_v7 = vadd.f32 %v3714_v54, %v2391_v17  ;;  %v5247_v54 = vsel %vm1651_vm10, %v1731_v62, %v1732_v47 }
 0x205   : > { %v3604_v59 = vpop.f32.mrb[13].mxu1  ;;  %v3722_v43 = vpop.f32.mrb[53].mxu0 }
 0x206   : > { %v3605_v8 = vadd.f32 %v3604_v59, %v3603_v45  ;;  %v3606_v9 = vpop.f32.mrb[14].mxu1  ;;  %v3723_v30 = vadd.f32 %v3722_v43, %v3721_v26  ;;  %v3724_v3 = vpop.f32.mrb[54].mxu0 }
 0x207   : > { %v3607_v49 = vpop.f32.mrb[15].mxu1  ;;  %v3725_v29 = vpop.f32.mrb[55].mxu0 }
 0x208   : > { %v2396_v38 = vadd.f32 %v3605_v8, %v5188_v50  ;;  %v3608_v52 = vadd.f32 %v3607_v49, %v3606_v9  ;;  %v3726_v46 = vadd.f32 %v3725_v29, %v3724_v3 }
 0x209   : > { %2804 = vmatmul.mubr.bf16.gmra.mrb[120].mxu1 %v5108_v24  ;;  %2973 = vmatmul.mubr.bf16.gmra.mrb[160].mxu0 %v5206_v44 }
 0x20a   : > { %v2399_v22 = vadd.f32 %v3608_v52, %v5188_v50  ;;  %2811 = vmatprep.mubr.bf16.mxu1 %v5247_v54  ;;  %v5252_v23 = vadd.f32 %v3717_v14, %v2396_v38 }
 0x20c   : > { %v3609_v10 = vpop.f32.mrb[16].mxu1  ;;  %v3727_v28 = vpop.f32.mrb[56].mxu0  ;;  %v5254_v63 = vadd.f32 %v3720_v53, %v2399_v22 }
 0x20d   : > { %v3610_v56 = vpop.f32.mrb[17].mxu1  ;;  %v3728_v58 = vpop.f32.mrb[57].mxu0 }
 0x20e   : > { %v3611_v0 = vadd.f32 %v3610_v56, %v3609_v10  ;;  %v3612_v61 = vpop.f32.mrb[18].mxu1  ;;  %v3729_v24 = vadd.f32 %v3728_v58, %v3727_v28  ;;  %v3730_v1 = vpop.f32.mrb[58].mxu0 }
 0x20f   : > { %v3613_v13 = vpop.f32.mrb[19].mxu1  ;;  %v3731_v25 = vpop.f32.mrb[59].mxu0 }
 0x210   : > { %v2404_v6 = vadd.f32 %v3611_v0, %v5188_v50  ;;  %v3614_v4 = vadd.f32 %v3613_v13, %v3612_v61  ;;  %v3732_v35 = vadd.f32 %v3731_v25, %v3730_v1 }
 0x211   : > { %2812 = vmatmul.mubr.bf16.gmra.mrb[124].mxu1 %v5221_v60 }
 0x212   : > { %v2407_v14 = vadd.f32 %v3614_v4, %v5188_v50  ;;  %4109 = vmatprep.mubr.bf16.mxu1 %v4646_v36  ;;  %v5260_v33 = vadd.f32 %v3723_v30, %v2404_v6 }
 0x214   : > { %v3615_v2 = vpop.f32.mrb[20].mxu1  ;;  %v3733_v39 = vpop.f32.mrb[60].mxu0  ;;  %v5262_v41 = vadd.f32 %v3726_v46, %v2407_v14 }
 0x215   : > { %v3616_v53 = vpop.f32.mrb[21].mxu1  ;;  %v3734_v18 = vpop.f32.mrb[61].mxu0 }
 0x216   : > { %v3617_v17 = vadd.f32 %v3616_v53, %v3615_v2  ;;  %v3618_v45 = vpop.f32.mrb[22].mxu1  ;;  %v3735_v26 = vadd.f32 %v3734_v18, %v3733_v39  ;;  %v3736_v59 = vpop.f32.mrb[62].mxu0 }
 0x217   : > { %v3619_v43 = vpop.f32.mrb[23].mxu1  ;;  %v3737_v62 = vpop.f32.mrb[63].mxu0 }
 0x218   : > { %v2412_v60 = vadd.f32 %v3617_v17, %v5188_v50  ;;  %v3620_v47 = vadd.f32 %v3619_v43, %v3618_v45  ;;  %v3738_v8 = vadd.f32 %v3737_v62, %v3736_v59 }
 0x219   : > { %4110 = vmatmul.mubr.bf16.vlgmr.msra.gmra.mrb[128].mxu1 %v4724_v31 }
 0x21a   : > { %v2415_v36 = vadd.f32 %v3620_v47, %v5188_v50  ;;  %4113 = vmatprep.mubr.bf16.mxu1 %v4802_v21  ;;  %v5268_v9 = vadd.f32 %v3729_v24, %v2412_v60 }
 0x21c   : > { %v3621_v30 = vpop.f32.mrb[24].mxu1  ;;  %v3739_v3 = vpop.f32.mrb[64].mxu0  ;;  %v5270_v49 = vadd.f32 %v3732_v35, %v2415_v36 }
 0x21d   : > { %v3622_v29 = vpop.f32.mrb[25].mxu1  ;;  %v3740_v38 = vpop.f32.mrb[65].mxu0 }
 0x21e   : > { %v3623_v52 = vadd.f32 %v3622_v29, %v3621_v30  ;;  %v3624_v46 = vpop.f32.mrb[26].mxu1  ;;  %v3741_v22 = vadd.f32 %v3740_v38, %v3739_v3  ;;  %v3742_v10 = vpop.f32.mrb[66].mxu0 }
 0x21f   : > { %v3625_v28 = vpop.f32.mrb[27].mxu1  ;;  %v3743_v56 = vpop.f32.mrb[67].mxu0 }
 0x220   : > { %v2420_v31 = vadd.f32 %v3623_v52, %v5188_v50  ;;  %v3626_v58 = vadd.f32 %v3625_v28, %v3624_v46  ;;  %v3744_v0 = vadd.f32 %v3743_v56, %v3742_v10 }
 0x221   : > { %4114 = vmatmul.mubr.bf16.gmra.mrb[132].mxu1 %v4832_v48 }
 0x222   : > { %v2423_v21 = vadd.f32 %v3626_v58, %v5188_v50  ;;  %4117 = vmatprep.mubr.bf16.mxu1 %v4892_v51  ;;  %v5276_v61 = vadd.f32 %v3735_v26, %v2420_v31 }
 0x224   : > { %v3627_v24 = vpop.f32.mrb[28].mxu1  ;;  %v3745_v1 = vpop.f32.mrb[68].mxu0  ;;  %v5278_v13 = vadd.f32 %v3738_v8, %v2423_v21 }
 0x225   : > { %v3628_v25 = vpop.f32.mrb[29].mxu1  ;;  %v3746_v6 = vpop.f32.mrb[69].mxu0 }
 0x226   : > { %v3629_v4 = vadd.f32 %v3628_v25, %v3627_v24  ;;  %v3630_v35 = vpop.f32.mrb[30].mxu1  ;;  %v3747_v14 = vadd.f32 %v3746_v6, %v3745_v1  ;;  %v3748_v2 = vpop.f32.mrb[70].mxu0 }
 0x227   : > { %v3631_v39 = vpop.f32.mrb[31].mxu1  ;;  %v3749_v53 = vpop.f32.mrb[71].mxu0 }
 0x228   : > { %v2428_v48 = vadd.f32 %v3629_v4, %v5188_v50  ;;  %v3632_v18 = vadd.f32 %v3631_v39, %v3630_v35  ;;  %v3750_v17 = vadd.f32 %v3749_v53, %v3748_v2 }
 0x229   : > { %4118 = vmatmul.mubr.bf16.gmra.mrb[136].mxu1 %v4922_v40 }
 0x22a   : > { %v2431_v51 = vadd.f32 %v3632_v18, %v5188_v50  ;;  %4121 = vmatprep.mubr.bf16.mxu1 %v4943_v55  ;;  %v5284_v45 = vadd.f32 %v3741_v22, %v2428_v48 }
 0x22c   : > { %v3633_v26 = vpop.f32.mrb[32].mxu1  ;;  %v3751_v59 = vpop.f32.mrb[72].mxu0  ;;  %v5286_v43 = vadd.f32 %v3744_v0, %v2431_v51 }
 0x22d   : > { %v3634_v62 = vpop.f32.mrb[33].mxu1  ;;  %v3752_v60 = vpop.f32.mrb[73].mxu0 }
 0x22e   : > { %v3635_v47 = vadd.f32 %v3634_v62, %v3633_v26  ;;  %v3636_v8 = vpop.f32.mrb[34].mxu1  ;;  %v3753_v36 = vadd.f32 %v3752_v60, %v3751_v59  ;;  %v3754_v30 = vpop.f32.mrb[74].mxu0 }
 0x22f   : > { %v3637_v3 = vpop.f32.mrb[35].mxu1  ;;  %v3755_v29 = vpop.f32.mrb[75].mxu0 }
 0x230   : > { %v2436_v40 = vadd.f32 %v3635_v47, %v5188_v50  ;;  %v3638_v38 = vadd.f32 %v3637_v3, %v3636_v8  ;;  %v3756_v52 = vadd.f32 %v3755_v29, %v3754_v30 }
 0x231   : > { %4122 = vmatmul.mubr.bf16.gmra.mrb[140].mxu1 %v4975_v5 }
 0x232   : > { %v2439_v55 = vadd.f32 %v3638_v38, %v5188_v50  ;;  %4125 = vmatprep.mubr.bf16.mxu1 %v4999_v19  ;;  %v5292_v46 = vadd.f32 %v3747_v14, %v2436_v40 }
 0x234   : > { %v3639_v22 = vpop.f32.mrb[36].mxu1  ;;  %v3757_v10 = vpop.f32.mrb[76].mxu0  ;;  %v5294_v28 = vadd.f32 %v3750_v17, %v2439_v55 }
 0x235   : > { %v3640_v56 = vpop.f32.mrb[37].mxu1  ;;  %v3758_v31 = vpop.f32.mrb[77].mxu0 }
 0x236   : > { %v3641_v58 = vadd.f32 %v3640_v56, %v3639_v22  ;;  %v3642_v0 = vpop.f32.mrb[38].mxu1  ;;  %v3759_v21 = vadd.f32 %v3758_v31, %v3757_v10  ;;  %v3760_v24 = vpop.f32.mrb[78].mxu0 }
 0x237   : > { %v3643_v1 = vpop.f32.mrb[39].mxu1  ;;  %v3761_v25 = vpop.f32.mrb[79].mxu0 }
 0x238   : > { %v2444_v5 = vadd.f32 %v3641_v58, %v5188_v50  ;;  %v3644_v6 = vadd.f32 %v3643_v1, %v3642_v0  ;;  %v3762_v4 = vadd.f32 %v3761_v25, %v3760_v24  ;;  %v1750_v1 = vrot.slane %v5206_v44, 1 }
 0x239   : > { %4126 = vmatmul.mubr.bf16.gmra.mrb[144].mxu1 %v5026_v57  ;;  %v1751_v25 = vrot.slane %v5215_v27, 1 }
 0x23a   : > { %v2447_v19 = vadd.f32 %v3644_v6, %v5188_v50  ;;  %4129 = vmatprep.mubr.bf16.mxu1 %v5047_v16  ;;  %v5300_v35 = vadd.f32 %v3753_v36, %v2444_v5 }
 0x23c   : > { %v3645_v14 = vpop.f32.mrb[40].mxu1  ;;  %v3763_v2 = vpop.f32.mrb[80].mxu0  ;;  %v5302_v39 = vadd.f32 %v3756_v52, %v2447_v19 }
 0x23d   : > { %v3646_v53 = vpop.f32.mrb[41].mxu1  ;;  %v3764_v48 = vpop.f32.mrb[81].mxu0 }
 0x23e   : > { %v3647_v18 = vadd.f32 %v3646_v53, %v3645_v14  ;;  %v3648_v17 = vpop.f32.mrb[42].mxu1  ;;  %v3765_v51 = vadd.f32 %v3764_v48, %v3763_v2  ;;  %v3766_v26 = vpop.f32.mrb[82].mxu0 }
 0x23f   : > { %v3649_v59 = vpop.f32.mrb[43].mxu1  ;;  %v3767_v62 = vpop.f32.mrb[83].mxu0 }
 0x240   : > { %v2452_v57 = vadd.f32 %v3647_v18, %v5188_v50  ;;  %v3650_v60 = vadd.f32 %v3649_v59, %v3648_v17  ;;  %v3768_v47 = vadd.f32 %v3767_v62, %v3766_v26  ;;  %v1752_v17 = vsel %vm1651_vm10, %v1750_v1, %v1751_v25 }
 0x241   : > { %4130 = vmatmul.mubr.bf16.gmra.mrb[148].mxu1 %v5068_v12 }
 0x242   : > { %v2455_v16 = vadd.f32 %v3650_v60, %v5188_v50  ;;  %4133 = vmatprep.mubr.bf16.mxu1 %v5092_v20  ;;  %v5308_v8 = vadd.f32 %v3759_v21, %v2452_v57 }
 0x244   : > { %v3651_v36 = vpop.f32.mrb[44].mxu1  ;;  %v3769_v30 = vpop.f32.mrb[84].mxu0  ;;  %v5310_v3 = vadd.f32 %v3762_v4, %v2455_v16 }
 0x245   : > { %v3652_v29 = vpop.f32.mrb[45].mxu1  ;;  %v3770_v40 = vpop.f32.mrb[85].mxu0 }
 0x246   : > { %v3653_v38 = vadd.f32 %v3652_v29, %v3651_v36  ;;  %v3654_v52 = vpop.f32.mrb[46].mxu1  ;;  %v3771_v55 = vadd.f32 %v3770_v40, %v3769_v30  ;;  %v3772_v22 = vpop.f32.mrb[86].mxu0 }
 0x247   : > { %v3655_v10 = vpop.f32.mrb[47].mxu1  ;;  %v3773_v56 = vpop.f32.mrb[87].mxu0 }
 0x248   : > { %v2460_v12 = vadd.f32 %v3653_v38, %v5188_v50  ;;  %v3656_v31 = vadd.f32 %v3655_v10, %v3654_v52  ;;  %v3774_v58 = vadd.f32 %v3773_v56, %v3772_v22 }
 0x249   : > { %4134 = vmatmul.mubr.bf16.gmra.mrb[152].mxu1 %v5104_v37 }
 0x24a   : > { %v2463_v20 = vadd.f32 %v3656_v31, %v5188_v50  ;;  %4137 = vmatprep.mubr.bf16.mxu1 %v5247_v54  ;;  %v5316_v0 = vadd.f32 %v3765_v51, %v2460_v12 }
 0x24c   : > { %v3657_v21 = vpop.f32.mrb[48].mxu1  ;;  %v3775_v24 = vpop.f32.mrb[88].mxu0  ;;  %v5320_v5 = vadd.f32 %v3768_v47, %v2463_v20 }
 0x24d   : > { %v3658_v6 = vpop.f32.mrb[49].mxu1  ;;  %v3776_v4 = vpop.f32.mrb[89].mxu0 }
 0x24e   : > { %v3659_v19 = vadd.f32 %v3658_v6, %v3657_v21  ;;  %v3660_v14 = vpop.f32.mrb[50].mxu1  ;;  %v3777_v2 = vadd.f32 %v3776_v4, %v3775_v24  ;;  %v3778_v37 = vpop.f32.mrb[90].mxu0 }
 0x24f   : > { %v3661_v53 = vpop.f32.mrb[51].mxu1  ;;  %v3779_v48 = vpop.f32.mrb[91].mxu0 }
 0x250   : > { %v2468_v54 = vadd.f32 %v3659_v19, %v5188_v50  ;;  %v3662_v18 = vadd.f32 %v3661_v53, %v3660_v14  ;;  %v3780_v51 = vadd.f32 %v3779_v48, %v3778_v37 }
 0x251   : > { %4138 = vmatmul.mubr.bf16.gmra.mrb[156].mxu1 %v1752_v17 }
 0x252   : > { %v2471_v44 = vadd.f32 %v3662_v18, %v5188_v50  ;;  %v5325_v27 = vadd.f32 %v3771_v55, %v2468_v54 }
 0x254   : > { %v3663_v26 = vpop.f32.mrb[52].mxu1  ;;  %v3781_v59 = vpop.f32.mrb[92].mxu0  ;;  %v5327_v62 = vadd.f32 %v3774_v58, %v2471_v44 }
 0x255   : > { %v3664_v57 = vpop.f32.mrb[53].mxu1  ;;  %v3782_v60 = vpop.f32.mrb[93].mxu0 }
 0x256   : > { %v3665_v47 = vadd.f32 %v3664_v57, %v3663_v26  ;;  %v3666_v16 = vpop.f32.mrb[54].mxu1  ;;  %v3783_v36 = vadd.f32 %v3782_v60, %v3781_v59  ;;  %v3784_v30 = vpop.f32.mrb[94].mxu0 }
 0x257   : > { %v3667_v29 = vpop.f32.mrb[55].mxu1  ;;  %v3785_v40 = vpop.f32.mrb[95].mxu0 }
 0x258   : > { %v2476_v38 = vadd.f32 %v3665_v47, %v5188_v50  ;;  %v3668_v52 = vadd.f32 %v3667_v29, %v3666_v16  ;;  %v3786_v22 = vadd.f32 %v3785_v40, %v3784_v30 }
 0x25a   : > { %v2479_v10 = vadd.f32 %v3668_v52, %v5188_v50  ;;  %v5331_v55 = vadd.f32 %v3777_v2, %v2476_v38 }
 0x25c   : > { %v3669_v56 = vpop.f32.mrb[56].mxu1  ;;  %v3787_v12 = vpop.f32.mrb[96].mxu0  ;;  %v5333_v31 = vadd.f32 %v3780_v51, %v2479_v10 }
 0x25d   : > { %v3670_v58 = vpop.f32.mrb[57].mxu1  ;;  %v3788_v20 = vpop.f32.mrb[97].mxu0 }
 0x25e   : > { %v3671_v21 = vadd.f32 %v3670_v58, %v3669_v56  ;;  %v3672_v24 = vpop.f32.mrb[58].mxu1  ;;  %v3789_v1 = vadd.f32 %v3788_v20, %v3787_v12  ;;  %v3790_v25 = vpop.f32.mrb[98].mxu0 }
 0x25f   : > { %v3673_v6 = vpop.f32.mrb[59].mxu1  ;;  %v3791_v4 = vpop.f32.mrb[99].mxu0 }
 0x260   : > { %v2484_v19 = vadd.f32 %v3671_v21, %v5188_v50  ;;  %v3674_v14 = vadd.f32 %v3673_v6, %v3672_v24  ;;  %v3792_v37 = vadd.f32 %v3791_v4, %v3790_v25 }
 0x262   : > { %v2487_v53 = vadd.f32 %v3674_v14, %v5188_v50  ;;  %v5337_v2 = vadd.f32 %v3783_v36, %v2484_v19 }
 0x264   : > { %v3675_v48 = vpop.f32.mrb[60].mxu1  ;;  %v3921_v54 = vpop.f32.mrb[100].mxu0  ;;  %v5339_v18 = vadd.f32 %v3786_v22, %v2487_v53 }
 0x265   : > { %v3676_v17 = vpop.f32.mrb[61].mxu1  ;;  %v3922_v51 = vpop.f32.mrb[101].mxu0 }
 0x266   : > { %v3677_v44 = vadd.f32 %v3676_v17, %v3675_v48  ;;  %v3678_v26 = vpop.f32.mrb[62].mxu1  ;;  %v3923_v59 = vadd.f32 %v3922_v51, %v3921_v54  ;;  %v3924_v57 = vpop.f32.mrb[102].mxu0 }
 0x267   : > { %v3679_v60 = vpop.f32.mrb[63].mxu1  ;;  %v3925_v47 = vpop.f32.mrb[103].mxu0 }
 0x268   : > { %v2492_v16 = vadd.f32 %v3677_v44, %v5188_v50  ;;  %v3680_v30 = vadd.f32 %v3679_v60, %v3678_v26  ;;  %v3926_v29 = vadd.f32 %v3925_v47, %v3924_v57 }
 0x26a   : > { %v2495_v40 = vadd.f32 %v3680_v30, %v5188_v50  ;;  %v5343_v36 = vadd.f32 %v3789_v1, %v2492_v16 }
 0x26c   : > { %v3809_v38 = vpop.f32.mrb[64].mxu1  ;;  %v3927_v52 = vpop.f32.mrb[104].mxu0  ;;  %v5345_v22 = vadd.f32 %v3792_v37, %v2495_v40 }
 0x26d   : > { %v3810_v10 = vpop.f32.mrb[65].mxu1  ;;  %v3928_v56 = vpop.f32.mrb[105].mxu0 }
 0x26e   : > { %v3811_v12 = vadd.f32 %v3810_v10, %v3809_v38  ;;  %v3812_v58 = vpop.f32.mrb[66].mxu1  ;;  %v3929_v20 = vadd.f32 %v3928_v56, %v3927_v52  ;;  %v3930_v21 = vpop.f32.mrb[106].mxu0 }
 0x26f   : > { %v3813_v24 = vpop.f32.mrb[67].mxu1  ;;  %v3931_v25 = vpop.f32.mrb[107].mxu0 }
 0x270   : > { %v2694_v6 = vadd.f32 %v3811_v12, %v5208_v32  ;;  %v3814_v4 = vadd.f32 %v3813_v24, %v3812_v58  ;;  %v3932_v19 = vadd.f32 %v3931_v25, %v3930_v21 }
 0x272   : > { %v2697_v50 = vadd.f32 %v3814_v4, %v5210_v15  ;;  %v5349_v1 = vadd.f32 %v3923_v59, %v2694_v6 }
 0x274   : > { %v3815_v14 = vpop.f32.mrb[68].mxu1  ;;  %v3933_v53 = vpop.f32.mrb[108].mxu0  ;;  %v5351_v37 = vadd.f32 %v3926_v29, %v2697_v50 }
 0x275   : > { %v3816_v48 = vpop.f32.mrb[69].mxu1  ;;  %v3934_v54 = vpop.f32.mrb[109].mxu0 }
 0x276   : > { %v3817_v17 = vadd.f32 %v3816_v48, %v3815_v14  ;;  %v3818_v51 = vpop.f32.mrb[70].mxu1  ;;  %v3935_v44 = vadd.f32 %v3934_v54, %v3933_v53  ;;  %v3936_v26 = vpop.f32.mrb[110].mxu0 }
 0x277   : > { %v3819_v57 = vpop.f32.mrb[71].mxu1  ;;  %v3937_v60 = vpop.f32.mrb[111].mxu0 }
 0x278   : > { %v2702_v32 = vadd.f32 %v3817_v17, %v5228_v42  ;;  %v3820_v47 = vadd.f32 %v3819_v57, %v3818_v51  ;;  %v3938_v16 = vadd.f32 %v3937_v60, %v3936_v26 }
 0x27a   : > { %v2705_v15 = vadd.f32 %v3820_v47, %v5230_v34  ;;  %v5355_v59 = vadd.f32 %v3929_v20, %v2702_v32 }
 0x27c   : > { %v3821_v30 = vpop.f32.mrb[72].mxu1  ;;  %v3939_v40 = vpop.f32.mrb[112].mxu0  ;;  %v5357_v29 = vadd.f32 %v3932_v19, %v2705_v15 }
 0x27d   : > { %v3822_v38 = vpop.f32.mrb[73].mxu1  ;;  %v3940_v52 = vpop.f32.mrb[113].mxu0 }
 0x27e   : > { %v3823_v10 = vadd.f32 %v3822_v38, %v3821_v30  ;;  %v3824_v56 = vpop.f32.mrb[74].mxu1  ;;  %v3941_v12 = vadd.f32 %v3940_v52, %v3939_v40  ;;  %v3942_v58 = vpop.f32.mrb[114].mxu0 }
 0x27f   : > { %v3825_v21 = vpop.f32.mrb[75].mxu1  ;;  %v3943_v24 = vpop.f32.mrb[115].mxu0 }
 0x280   : > { %v2710_v42 = vadd.f32 %v3823_v10, %v5238_v11  ;;  %v3826_v25 = vadd.f32 %v3825_v21, %v3824_v56  ;;  %v3944_v6 = vadd.f32 %v3943_v24, %v3942_v58 }
 0x282   : > { %v2713_v34 = vadd.f32 %v3826_v25, %v5240_v7  ;;  %v5361_v20 = vadd.f32 %v3935_v44, %v2710_v42 }
 0x284   : > { %v3827_v4 = vpop.f32.mrb[76].mxu1  ;;  %v3945_v50 = vpop.f32.mrb[116].mxu0  ;;  %v5363_v19 = vadd.f32 %v3938_v16, %v2713_v34 }
 0x285   : > { %v3828_v14 = vpop.f32.mrb[77].mxu1  ;;  %v3946_v53 = vpop.f32.mrb[117].mxu0 }
 0x286   : > { %v3829_v48 = vadd.f32 %v3828_v14, %v3827_v4  ;;  %v3830_v54 = vpop.f32.mrb[78].mxu1  ;;  %v3947_v17 = vadd.f32 %v3946_v53, %v3945_v50  ;;  %v3948_v51 = vpop.f32.mrb[118].mxu0 }
 0x287   : > { %v3831_v26 = vpop.f32.mrb[79].mxu1  ;;  %v3949_v57 = vpop.f32.mrb[119].mxu0 }
 0x288   : > { %v2718_v11 = vadd.f32 %v3829_v48, %v5252_v23  ;;  %v3832_v60 = vadd.f32 %v3831_v26, %v3830_v54  ;;  %v3950_v32 = vadd.f32 %v3949_v57, %v3948_v51 }
 0x28a   : > { %v2721_v7 = vadd.f32 %v3832_v60, %v5254_v63  ;;  %v5367_v44 = vadd.f32 %v3941_v12, %v2718_v11 }
 0x28c   : > { %v3833_v47 = vpop.f32.mrb[80].mxu1  ;;  %v3951_v15 = vpop.f32.mrb[120].mxu0  ;;  %v5369_v16 = vadd.f32 %v3944_v6, %v2721_v7 }
 0x28d   : > { %v3834_v30 = vpop.f32.mrb[81].mxu1  ;;  %v3952_v40 = vpop.f32.mrb[121].mxu0 }
 0x28e   : > { %v3835_v38 = vadd.f32 %v3834_v30, %v3833_v47  ;;  %v3836_v52 = vpop.f32.mrb[82].mxu1  ;;  %v3953_v10 = vadd.f32 %v3952_v40, %v3951_v15  ;;  %v3954_v56 = vpop.f32.mrb[122].mxu0 }
 0x28f   : > { %v3837_v58 = vpop.f32.mrb[83].mxu1  ;;  %v3955_v21 = vpop.f32.mrb[123].mxu0 }
 0x290   : > { %v2726_v23 = vadd.f32 %v3835_v38, %v5260_v33  ;;  %v3838_v24 = vadd.f32 %v3837_v58, %v3836_v52  ;;  %v3956_v42 = vadd.f32 %v3955_v21, %v3954_v56 }
 0x292   : > { %v2729_v63 = vadd.f32 %v3838_v24, %v5262_v41  ;;  %v5373_v12 = vadd.f32 %v3947_v17, %v2726_v23 }
 0x294   : > { %v3839_v25 = vpop.f32.mrb[84].mxu1  ;;  %v3957_v34 = vpop.f32.mrb[124].mxu0  ;;  %v5375_v6 = vadd.f32 %v3950_v32, %v2729_v63 }
 0x295   : > { %v3840_v4 = vpop.f32.mrb[85].mxu1  ;;  %v3958_v50 = vpop.f32.mrb[125].mxu0 }
 0x296   : > { %v3841_v14 = vadd.f32 %v3840_v4, %v3839_v25  ;;  %v3842_v53 = vpop.f32.mrb[86].mxu1  ;;  %v3959_v48 = vadd.f32 %v3958_v50, %v3957_v34  ;;  %v3960_v54 = vpop.f32.mrb[126].mxu0 }
 0x297   : > { %v3843_v51 = vpop.f32.mrb[87].mxu1  ;;  %v3961_v26 = vpop.f32.mrb[127].mxu0 }
 0x298   : > { %v2734_v33 = vadd.f32 %v3841_v14, %v5268_v9  ;;  %v3844_v57 = vadd.f32 %v3843_v51, %v3842_v53  ;;  %v3962_v11 = vadd.f32 %v3961_v26, %v3960_v54 }
 0x29a   : > { %v2737_v41 = vadd.f32 %v3844_v57, %v5270_v49  ;;  %v5379_v17 = vadd.f32 %v3953_v10, %v2734_v33 }
 0x29c   : > { %v3845_v60 = vpop.f32.mrb[88].mxu1  ;;  %v3963_v7 = vpop.f32.mrb[128].mxu0  ;;  %v5381_v32 = vadd.f32 %v3956_v42, %v2737_v41 }
 0x29d   : > { %v3846_v47 = vpop.f32.mrb[89].mxu1  ;;  %v3964_v15 = vpop.f32.mrb[129].mxu0 }
 0x29e   : > { %v3847_v30 = vadd.f32 %v3846_v47, %v3845_v60  ;;  %v3848_v40 = vpop.f32.mrb[90].mxu1  ;;  %v3965_v38 = vadd.f32 %v3964_v15, %v3963_v7  ;;  %v3966_v52 = vpop.f32.mrb[130].mxu0 }
 0x29f   : > { %v3849_v56 = vpop.f32.mrb[91].mxu1  ;;  %v3967_v58 = vpop.f32.mrb[131].mxu0 }
 0x2a0   : > { %v2742_v9 = vadd.f32 %v3847_v30, %v5276_v61  ;;  %v3850_v21 = vadd.f32 %v3849_v56, %v3848_v40  ;;  %v3968_v23 = vadd.f32 %v3967_v58, %v3966_v52 }
 0x2a2   : > { %v2745_v49 = vadd.f32 %v3850_v21, %v5278_v13  ;;  %v5385_v10 = vadd.f32 %v3959_v48, %v2742_v9 }
 0x2a4   : > { %v3851_v24 = vpop.f32.mrb[92].mxu1  ;;  %v3969_v63 = vpop.f32.mrb[132].mxu0  ;;  %v5387_v42 = vadd.f32 %v3962_v11, %v2745_v49 }
 0x2a5   : > { %v3852_v25 = vpop.f32.mrb[93].mxu1  ;;  %v3970_v34 = vpop.f32.mrb[133].mxu0 }
 0x2a6   : > { %v3853_v4 = vadd.f32 %v3852_v25, %v3851_v24  ;;  %v3854_v50 = vpop.f32.mrb[94].mxu1  ;;  %v3971_v14 = vadd.f32 %v3970_v34, %v3969_v63  ;;  %v3972_v53 = vpop.f32.mrb[134].mxu0 }
 0x2a7   : > { %v3855_v54 = vpop.f32.mrb[95].mxu1  ;;  %v3973_v51 = vpop.f32.mrb[135].mxu0 }
 0x2a8   : > { %v2750_v61 = vadd.f32 %v3853_v4, %v5284_v45  ;;  %v3856_v26 = vadd.f32 %v3855_v54, %v3854_v50  ;;  %v3974_v33 = vadd.f32 %v3973_v51, %v3972_v53 }
 0x2aa   : > { %v2753_v13 = vadd.f32 %v3856_v26, %v5286_v43  ;;  %v5391_v48 = vadd.f32 %v3965_v38, %v2750_v61 }
 0x2ac   : > { %v3857_v57 = vpop.f32.mrb[96].mxu1  ;;  %v3975_v41 = vpop.f32.mrb[136].mxu0  ;;  %v5393_v11 = vadd.f32 %v3968_v23, %v2753_v13 }
 0x2ad   : > { %v3858_v60 = vpop.f32.mrb[97].mxu1  ;;  %v3976_v7 = vpop.f32.mrb[137].mxu0 }
 0x2ae   : > { %v3859_v47 = vadd.f32 %v3858_v60, %v3857_v57  ;;  %v3860_v15 = vpop.f32.mrb[98].mxu1  ;;  %v3977_v30 = vadd.f32 %v3976_v7, %v3975_v41  ;;  %v3978_v40 = vpop.f32.mrb[138].mxu0 }
 0x2af   : > { %v3861_v52 = vpop.f32.mrb[99].mxu1  ;;  %v3979_v56 = vpop.f32.mrb[139].mxu0 }
 0x2b0   : > { %v2758_v45 = vadd.f32 %v3859_v47, %v5292_v46  ;;  %v3862_v58 = vadd.f32 %v3861_v52, %v3860_v15  ;;  %v3980_v9 = vadd.f32 %v3979_v56, %v3978_v40 }
 0x2b2   : > { %v2761_v43 = vadd.f32 %v3862_v58, %v5294_v28  ;;  %v5397_v38 = vadd.f32 %v3971_v14, %v2758_v45 }
 0x2b4   : > { %v3863_v21 = vpop.f32.mrb[100].mxu1  ;;  %v3981_v49 = vpop.f32.mrb[140].mxu0  ;;  %v5399_v23 = vadd.f32 %v3974_v33, %v2761_v43 }
 0x2b5   : > { %v3864_v24 = vpop.f32.mrb[101].mxu1  ;;  %v3982_v63 = vpop.f32.mrb[141].mxu0 }
 0x2b6   : > { %v3865_v25 = vadd.f32 %v3864_v24, %v3863_v21  ;;  %v3866_v34 = vpop.f32.mrb[102].mxu1  ;;  %v3983_v4 = vadd.f32 %v3982_v63, %v3981_v49  ;;  %v3984_v50 = vpop.f32.mrb[142].mxu0 }
 0x2b7   : > { %v3867_v53 = vpop.f32.mrb[103].mxu1  ;;  %v3985_v54 = vpop.f32.mrb[143].mxu0 }
 0x2b8   : > { %v2766_v46 = vadd.f32 %v3865_v25, %v5300_v35  ;;  %v3868_v51 = vadd.f32 %v3867_v53, %v3866_v34  ;;  %v3986_v61 = vadd.f32 %v3985_v54, %v3984_v50 }
 0x2ba   : > { %v2769_v28 = vadd.f32 %v3868_v51, %v5302_v39  ;;  %v5403_v14 = vadd.f32 %v3977_v30, %v2766_v46 }
 0x2bc   : > { %v3869_v26 = vpop.f32.mrb[104].mxu1  ;;  %v3987_v13 = vpop.f32.mrb[144].mxu0  ;;  %v5405_v33 = vadd.f32 %v3980_v9, %v2769_v28 }
 0x2bd   : > { %v3870_v57 = vpop.f32.mrb[105].mxu1  ;;  %v3988_v41 = vpop.f32.mrb[145].mxu0 }
 0x2be   : > { %v3871_v60 = vadd.f32 %v3870_v57, %v3869_v26  ;;  %v3872_v7 = vpop.f32.mrb[106].mxu1  ;;  %v3989_v47 = vadd.f32 %v3988_v41, %v3987_v13  ;;  %v3990_v15 = vpop.f32.mrb[146].mxu0 }
 0x2bf   : > { %v3873_v40 = vpop.f32.mrb[107].mxu1  ;;  %v3991_v52 = vpop.f32.mrb[147].mxu0 }
 0x2c0   : > { %v2774_v35 = vadd.f32 %v3871_v60, %v5308_v8  ;;  %v3874_v56 = vadd.f32 %v3873_v40, %v3872_v7  ;;  %v3992_v45 = vadd.f32 %v3991_v52, %v3990_v15 }
 0x2c2   : > { %v2777_v39 = vadd.f32 %v3874_v56, %v5310_v3  ;;  %v5409_v30 = vadd.f32 %v3983_v4, %v2774_v35 }
 0x2c4   : > { %v3875_v58 = vpop.f32.mrb[108].mxu1  ;;  %v3993_v43 = vpop.f32.mrb[148].mxu0  ;;  %v5411_v9 = vadd.f32 %v3986_v61, %v2777_v39 }
 0x2c5   : > { %v3876_v21 = vpop.f32.mrb[109].mxu1  ;;  %v3994_v49 = vpop.f32.mrb[149].mxu0 }
 0x2c6   : > { %v3877_v24 = vadd.f32 %v3876_v21, %v3875_v58  ;;  %v3878_v63 = vpop.f32.mrb[110].mxu1  ;;  %v3995_v25 = vadd.f32 %v3994_v49, %v3993_v43  ;;  %v3996_v34 = vpop.f32.mrb[150].mxu0 }
 0x2c7   : > { %v3879_v50 = vpop.f32.mrb[111].mxu1  ;;  %v3997_v53 = vpop.f32.mrb[151].mxu0 }
 0x2c8   : > { %v2782_v8 = vadd.f32 %v3877_v24, %v5316_v0  ;;  %v3880_v54 = vadd.f32 %v3879_v50, %v3878_v63  ;;  %v3998_v46 = vadd.f32 %v3997_v53, %v3996_v34 }
 0x2ca   : > { %v2785_v3 = vadd.f32 %v3880_v54, %v5320_v5  ;;  %v5415_v4 = vadd.f32 %v3989_v47, %v2782_v8 }
 0x2cc   : > { %v3881_v51 = vpop.f32.mrb[112].mxu1  ;;  %v3999_v28 = vpop.f32.mrb[152].mxu0  ;;  %v5417_v61 = vadd.f32 %v3992_v45, %v2785_v3 }
 0x2cd   : > { %v3882_v26 = vpop.f32.mrb[113].mxu1  ;;  %v4000_v13 = vpop.f32.mrb[153].mxu0 }
 0x2ce   : > { %v3883_v57 = vadd.f32 %v3882_v26, %v3881_v51  ;;  %v3884_v41 = vpop.f32.mrb[114].mxu1  ;;  %v4001_v60 = vadd.f32 %v4000_v13, %v3999_v28  ;;  %v4002_v7 = vpop.f32.mrb[154].mxu0 }
 0x2cf   : > { %v3885_v15 = vpop.f32.mrb[115].mxu1  ;;  %v4003_v40 = vpop.f32.mrb[155].mxu0 }
 0x2d0   : > { %v2790_v0 = vadd.f32 %v3883_v57, %v5325_v27  ;;  %v3886_v52 = vadd.f32 %v3885_v15, %v3884_v41  ;;  %v4004_v35 = vadd.f32 %v4003_v40, %v4002_v7 }
 0x2d2   : > { %v2793_v5 = vadd.f32 %v3886_v52, %v5327_v62  ;;  %v5421_v47 = vadd.f32 %v3995_v25, %v2790_v0 }
 0x2d4   : > { %v3887_v56 = vpop.f32.mrb[116].mxu1  ;;  %v4005_v39 = vpop.f32.mrb[156].mxu0  ;;  %v5423_v45 = vadd.f32 %v3998_v46, %v2793_v5 }
 0x2d5   : > { %v3888_v58 = vpop.f32.mrb[117].mxu1  ;;  %v4006_v43 = vpop.f32.mrb[157].mxu0 }
 0x2d6   : > { %v3889_v21 = vadd.f32 %v3888_v58, %v3887_v56  ;;  %v3890_v49 = vpop.f32.mrb[118].mxu1  ;;  %v4007_v24 = vadd.f32 %v4006_v43, %v4005_v39  ;;  %v4008_v63 = vpop.f32.mrb[158].mxu0 }
 0x2d7   : > { %v3891_v34 = vpop.f32.mrb[119].mxu1  ;;  %v4009_v50 = vpop.f32.mrb[159].mxu0 }
 0x2d8   : > { %v2798_v27 = vadd.f32 %v3889_v21, %v5331_v55  ;;  %v3892_v53 = vadd.f32 %v3891_v34, %v3890_v49  ;;  %v4010_v8 = vadd.f32 %v4009_v50, %v4008_v63 }
 0x2da   : > { %v2801_v62 = vadd.f32 %v3892_v53, %v5333_v31  ;;  %v5427_v25 = vadd.f32 %v4001_v60, %v2798_v27 }
 0x2dc   : > { %v3893_v54 = vpop.f32.mrb[120].mxu1  ;;  %v4011_v3 = vpop.f32.mrb[160].mxu0  ;;  %v5429_v46 = vadd.f32 %v4004_v35, %v2801_v62 }
 0x2dd   : > { %v3894_v51 = vpop.f32.mrb[121].mxu1  ;;  %v4012_v28 = vpop.f32.mrb[161].mxu0 }
 0x2de   : > { %v3895_v26 = vadd.f32 %v3894_v51, %v3893_v54  ;;  %v3896_v13 = vpop.f32.mrb[122].mxu1  ;;  %v4013_v57 = vadd.f32 %v4012_v28, %v4011_v3  ;;  %v4014_v41 = vpop.f32.mrb[162].mxu0  ;;  %v4245_v54 = vld [vmem:[%s4390_s28 + $0x10] sm:$0xff]  ;;  %v4246_v28 = vld [vmem:[%s4390_s28] sm:$0xff] }
 0x2df   : > { %v3897_v7 = vpop.f32.mrb[123].mxu1  ;;  %v4015_v15 = vpop.f32.mrb[163].mxu0 }
 0x2e0   : > { %v2806_v55 = vadd.f32 %v3895_v26, %v5337_v2  ;;  %v3898_v40 = vadd.f32 %v3897_v7, %v3896_v13  ;;  %v4016_v0 = vadd.f32 %v4015_v15, %v4014_v41  ;;  %v4247_v13 = vld [vmem:[%s4390_s28 + $0x18] sm:$0xff]  ;;  %v4248_v15 = vld [vmem:[%s4390_s28 + $0x8] sm:$0xff] }
 0x2e2   : > { %v2809_v31 = vadd.f32 %v3898_v40, %v5339_v18  ;;  %v5433_v60 = vadd.f32 %v4007_v24, %v2806_v55 }
 0x2e4   : > { %v3899_v52 = vpop.f32.mrb[124].mxu1  ;;  %v5435_v5 = vadd.f32 %v4010_v8, %v2809_v31 }
 0x2e5   : > { %v3900_v35 = vpop.f32.mrb[125].mxu1 }
 0x2e6   : > { %v3901_v56 = vadd.f32 %v3900_v35, %v3899_v52  ;;  %v3902_v39 = vpop.f32.mrb[126].mxu1 }
 0x2e7   : > { %v3903_v58 = vpop.f32.mrb[127].mxu1 }
 0x2e8   : > { %v2814_v43 = vadd.f32 %v3901_v56, %v5343_v36  ;;  %v3904_v21 = vadd.f32 %v3903_v58, %v3902_v39 }
 0x2ea   : > { %v2817_v49 = vadd.f32 %v3904_v21, %v5345_v22  ;;  %v5439_v2 = vadd.f32 %v4013_v57, %v2814_v43 }
 0x2ec   : > { %v4111_v63 = vpop.f32.mrb[128].mxu1  ;;  %v5441_v34 = vadd.f32 %v4016_v0, %v2817_v49 }
 0x2ed   : > { %v3024_v18 = vadd.f32 %v4111_v63, %v5355_v59  ;;  %v3015_v24 = vpop.f32.mrb[129].mxu1 }
 0x2ee   : > { %v3016_v50 = vadd.f32 %v3015_v24, %v5349_v1  ;;  %v4112_v27 = vpop.f32.mrb[130].mxu1  ;;  %v4250_v24 = vld [vmem:[%s4390_s28 + $0x20] sm:$0xff] }
 0x2ef   : > { %vm3144_vm7 = vcmp.ge.f32.partialorder %v3024_v18, 0.0  ;;  %v3176_v53 = vmul.f32 0.1, %v3024_v18  ;;  %v3027_v36 = vadd.f32 %v4112_v27, %v5357_v29  ;;  %v3018_v8 = vpop.f32.mrb[131].mxu1  ;;  %v4251_v27 = vld [vmem:[%s4390_s28 + $0x38] sm:$0xff] }
 0x2f0   : > { %vm3142_vm10 = vcmp.ge.f32.partialorder %v3016_v50, 0.0  ;;  %v3174_v22 = vmul.f32 0.1, %v3016_v50  ;;  %v3019_v62 = vadd.f32 %v3018_v8, %v5351_v37  ;;  %v4252_v8 = vld [vmem:[%s4390_s28 + $0x28] sm:$0xff] }
 0x2f1   : > { %v3208_v59 = vsel %vm3144_vm7, %v3024_v18, %v3176_v53  ;;  %vm3145_vm13 = vcmp.ge.f32.partialorder %v3027_v36, 0.0  ;;  %v3177_v1 = vmul.f32 0.1, %v3027_v36 }
 0x2f2   : > { %v3240_v3 = vadd.f32 %v4245_v54, %v3208_v59  ;;  %v3206_v29 = vsel %vm3142_vm10, %v3016_v50, %v3174_v22  ;;  %vm3143_vm15 = vcmp.ge.f32.partialorder %v3019_v62, 0.0  ;;  %v3175_v51 = vmul.f32 0.1, %v3019_v62 }
 0x2f3   : > { %v3238_v37 = vadd.f32 %v4246_v28, %v3206_v29  ;;  %v3209_v26 = vsel %vm3145_vm13, %v3027_v36, %v3177_v1 }
 0x2f4   : > { %3272 = vst [vmem:[%s5451_s19 + $0x10] sm:$0xff] %v3240_v3  ;;  %v3241_v57 = vadd.f32 %v4247_v13, %v3209_v26  ;;  %v3207_v41 = vsel %vm3143_vm15, %v3019_v62, %v3175_v51  ;;  %v4115_v7 = vpop.f32.mrb[132].mxu1 }
 0x2f5   : > { %3270 = vst [vmem:[%s5451_s19] sm:$0xff] %v3238_v37  ;;  %v3239_v55 = vadd.f32 %v4248_v15, %v3207_v41  ;;  %v3040_v40 = vadd.f32 %v4115_v7, %v5367_v44  ;;  %v3031_v0 = vpop.f32.mrb[133].mxu1  ;;  %v4254_v7 = vld [vmem:[%s4390_s28 + $0x40] sm:$0xff] }
 0x2f6   : > { %3273 = vst [vmem:[%s5451_s19 + $0x18] sm:$0xff] %v3241_v57  ;;  %v3032_v31 = vadd.f32 %v3031_v0, %v5361_v20  ;;  %v4116_v52 = vpop.f32.mrb[134].mxu1  ;;  %v4249_v20 = vld [vmem:[%s4390_s28 + $0x30] sm:$0xff] }
 0x2f7   : > { %3271 = vst [vmem:[%s5451_s19 + $0x8] sm:$0xff] %v3239_v55  ;;  %vm3148_vm0 = vcmp.ge.f32.partialorder %v3040_v40, 0.0  ;;  %v3180_v35 = vmul.f32 0.1, %v3040_v40  ;;  %v3043_v56 = vadd.f32 %v4116_v52, %v5369_v16  ;;  %v3034_v39 = vpop.f32.mrb[135].mxu1  ;;  %v4255_v55 = vld [vmem:[%s4390_s28 + $0x58] sm:$0xff] }
 0x2f8   : > { %vm3146_vm1 = vcmp.ge.f32.partialorder %v3032_v31, 0.0  ;;  %v3178_v58 = vmul.f32 0.1, %v3032_v31  ;;  %v3035_v43 = vadd.f32 %v3034_v39, %v5363_v19 }
 0x2f9   : > { %v3212_v44 = vsel %vm3148_vm0, %v3040_v40, %v3180_v35  ;;  %vm3149_vm2 = vcmp.ge.f32.partialorder %v3043_v56, 0.0  ;;  %v3181_v21 = vmul.f32 0.1, %v3043_v56 }
 0x2fa   : > { %v3244_v49 = vadd.f32 %v4249_v20, %v3212_v44  ;;  %v3210_v63 = vsel %vm3146_vm1, %v3032_v31, %v3178_v58  ;;  %vm3147_vm3 = vcmp.ge.f32.partialorder %v3035_v43, 0.0  ;;  %v3179_v18 = vmul.f32 0.1, %v3035_v43  ;;  %v4256_v31 = vld [vmem:[%s4390_s28 + $0x48] sm:$0xff] }
 0x2fb   : > { %v3242_v16 = vadd.f32 %v4250_v24, %v3210_v63  ;;  %v3213_v50 = vsel %vm3149_vm2, %v3043_v56, %v3181_v21 }
 0x2fc   : > { %3276 = vst [vmem:[%s5451_s19 + $0x30] sm:$0xff] %v3244_v49  ;;  %v3245_v53 = vadd.f32 %v4251_v27, %v3213_v50  ;;  %v3211_v36 = vsel %vm3147_vm3, %v3035_v43, %v3179_v18  ;;  %v4119_v19 = vpop.f32.mrb[136].mxu1  ;;  %v4258_v50 = vld [vmem:[%s4390_s28 + $0x60] sm:$0xff] }
 0x2fd   : > { %3274 = vst [vmem:[%s5451_s19 + $0x20] sm:$0xff] %v3242_v16  ;;  %v3243_v22 = vadd.f32 %v4252_v8, %v3211_v36  ;;  %v3056_v62 = vadd.f32 %v4119_v19, %v5379_v17  ;;  %v3047_v59 = vpop.f32.mrb[137].mxu1  ;;  %v4260_v8 = vld [vmem:[%s4390_s28 + $0x68] sm:$0xff] }
 0x2fe   : > { %3277 = vst [vmem:[%s5451_s19 + $0x38] sm:$0xff] %v3245_v53  ;;  %v3048_v1 = vadd.f32 %v3047_v59, %v5373_v12  ;;  %v4120_v54 = vpop.f32.mrb[138].mxu1  ;;  %v4253_v12 = vld [vmem:[%s4390_s28 + $0x50] sm:$0xff]  ;;  %v4259_v53 = vld [vmem:[%s4390_s28 + $0x78] sm:$0xff] }
 0x2ff   : > { %3275 = vst [vmem:[%s5451_s19 + $0x28] sm:$0xff] %v3243_v22  ;;  %vm3152_vm4 = vcmp.ge.f32.partialorder %v3056_v62, 0.0  ;;  %v3184_v3 = vmul.f32 0.1, %v3056_v62  ;;  %v3059_v29 = vadd.f32 %v4120_v54, %v5381_v32  ;;  %v3050_v51 = vpop.f32.mrb[139].mxu1 }
 0x300   : > { %vm3150_vm5 = vcmp.ge.f32.partialorder %v3048_v1, 0.0  ;;  %v3182_v28 = vmul.f32 0.1, %v3048_v1  ;;  %v3051_v37 = vadd.f32 %v3050_v51, %v5375_v6 }
 0x301   : > { %v3216_v17 = vsel %vm3152_vm4, %v3056_v62, %v3184_v3  ;;  %vm3153_vm6 = vcmp.ge.f32.partialorder %v3059_v29, 0.0  ;;  %v3185_v26 = vmul.f32 0.1, %v3059_v29 }
 0x302   : > { %v3248_v13 = vadd.f32 %v4253_v12, %v3216_v17  ;;  %v3214_v57 = vsel %vm3150_vm5, %v3048_v1, %v3182_v28  ;;  %vm3151_vm8 = vcmp.ge.f32.partialorder %v3051_v37, 0.0  ;;  %v3183_v41 = vmul.f32 0.1, %v3051_v37 }
 0x303   : > { %v3246_v32 = vadd.f32 %v4254_v7, %v3214_v57  ;;  %v3217_v15 = vsel %vm3153_vm6, %v3059_v29, %v3185_v26  ;;  %v4262_v57 = vld [vmem:[%s4390_s28 + $0x80] sm:$0xff]  ;;  %v4263_v7 = vld [vmem:[%s4390_s28 + $0x98] sm:$0xff] }
 0x304   : > { %3280 = vst [vmem:[%s5451_s19 + $0x50] sm:$0xff] %v3248_v13  ;;  %v3249_v40 = vadd.f32 %v4255_v55, %v3217_v15  ;;  %v3215_v0 = vsel %vm3151_vm8, %v3051_v37, %v3183_v41  ;;  %v4123_v6 = vpop.f32.mrb[140].mxu1  ;;  %v4264_v55 = vld [vmem:[%s4390_s28 + $0x88] sm:$0xff] }
 0x305   : > { %3278 = vst [vmem:[%s5451_s19 + $0x40] sm:$0xff] %v3246_v32  ;;  %v3247_v52 = vadd.f32 %v4256_v31, %v3215_v0  ;;  %v3072_v35 = vadd.f32 %v4123_v6, %v5391_v48  ;;  %v3063_v56 = vpop.f32.mrb[141].mxu1 }
 0x306   : > { %3281 = vst [vmem:[%s5451_s19 + $0x58] sm:$0xff] %v3249_v40  ;;  %v3064_v39 = vadd.f32 %v3063_v56, %v5385_v10  ;;  %v4124_v58 = vpop.f32.mrb[142].mxu1  ;;  %v4257_v10 = vld [vmem:[%s4390_s28 + $0x70] sm:$0xff] }
 0x307   : > { %3279 = vst [vmem:[%s5451_s19 + $0x48] sm:$0xff] %v3247_v52  ;;  %vm3156_vm9 = vcmp.ge.f32.partialorder %v3072_v35, 0.0  ;;  %v3188_v43 = vmul.f32 0.1, %v3072_v35  ;;  %v3075_v44 = vadd.f32 %v4124_v58, %v5393_v11  ;;  %v3066_v21 = vpop.f32.mrb[143].mxu1 }
 0x308   : > { %vm3154_vm11 = vcmp.ge.f32.partialorder %v3064_v39, 0.0  ;;  %v3186_v20 = vmul.f32 0.1, %v3064_v39  ;;  %v3067_v49 = vadd.f32 %v3066_v21, %v5387_v42 }
 0x309   : > { %v3220_v48 = vsel %vm3156_vm9, %v3072_v35, %v3188_v43  ;;  %vm3157_vm12 = vcmp.ge.f32.partialorder %v3075_v44, 0.0  ;;  %v3189_v63 = vmul.f32 0.1, %v3075_v44 }
 0x30a   : > { %v3252_v18 = vadd.f32 %v4257_v10, %v3220_v48  ;;  %v3218_v24 = vsel %vm3154_vm11, %v3064_v39, %v3186_v20  ;;  %vm3155_vm14 = vcmp.ge.f32.partialorder %v3067_v49, 0.0  ;;  %v3187_v16 = vmul.f32 0.1, %v3067_v49  ;;  %v4266_v48 = vld [vmem:[%s4390_s28 + $0xa0] sm:$0xff]  ;;  %v4267_v10 = vld [vmem:[%s4390_s28 + $0xb8] sm:$0xff] }
 0x30b   : > { %v3250_v11 = vadd.f32 %v4258_v50, %v3218_v24  ;;  %v3221_v27 = vsel %vm3157_vm12, %v3075_v44, %v3189_v63 }
 0x30c   : > { %3284 = vst [vmem:[%s5451_s19 + $0x70] sm:$0xff] %v3252_v18  ;;  %v3253_v36 = vadd.f32 %v4259_v53, %v3221_v27  ;;  %v3219_v19 = vsel %vm3155_vm14, %v3067_v49, %v3187_v16  ;;  %v4127_v42 = vpop.f32.mrb[144].mxu1  ;;  %v4268_v16 = vld [vmem:[%s4390_s28 + $0xa8] sm:$0xff] }
 0x30d   : > { %3282 = vst [vmem:[%s5451_s19 + $0x60] sm:$0xff] %v3250_v11  ;;  %v3251_v22 = vadd.f32 %v4260_v8, %v3219_v19  ;;  %v3088_v62 = vadd.f32 %v4127_v42, %v5403_v14  ;;  %v3079_v59 = vpop.f32.mrb[145].mxu1 }
 0x30e   : > { %3285 = vst [vmem:[%s5451_s19 + $0x78] sm:$0xff] %v3253_v36  ;;  %v3080_v1 = vadd.f32 %v3079_v59, %v5397_v38  ;;  %v4128_v54 = vpop.f32.mrb[146].mxu1  ;;  %v4261_v38 = vld [vmem:[%s4390_s28 + $0x90] sm:$0xff] }
 0x30f   : > { %3283 = vst [vmem:[%s5451_s19 + $0x68] sm:$0xff] %v3251_v22  ;;  %vm3160_vm7 = vcmp.ge.f32.partialorder %v3088_v62, 0.0  ;;  %v3192_v3 = vmul.f32 0.1, %v3088_v62  ;;  %v3091_v29 = vadd.f32 %v4128_v54, %v5405_v33  ;;  %v3082_v51 = vpop.f32.mrb[147].mxu1 }
 0x310   : > { %vm3158_vm10 = vcmp.ge.f32.partialorder %v3080_v1, 0.0  ;;  %v3190_v28 = vmul.f32 0.1, %v3080_v1  ;;  %v3083_v37 = vadd.f32 %v3082_v51, %v5399_v23 }
 0x311   : > { %v3224_v14 = vsel %vm3160_vm7, %v3088_v62, %v3192_v3  ;;  %vm3161_vm13 = vcmp.ge.f32.partialorder %v3091_v29, 0.0  ;;  %v3193_v17 = vmul.f32 0.1, %v3091_v29 }
 0x312   : > { %v3256_v26 = vadd.f32 %v4261_v38, %v3224_v14  ;;  %v3222_v12 = vsel %vm3158_vm10, %v3080_v1, %v3190_v28  ;;  %vm3159_vm15 = vcmp.ge.f32.partialorder %v3083_v37, 0.0  ;;  %v3191_v13 = vmul.f32 0.1, %v3083_v37  ;;  %v4271_v28 = vld [vmem:[%s4390_s28 + $0xd8] sm:$0xff] }
 0x313   : > { %v3254_v33 = vadd.f32 %v4262_v57, %v3222_v12  ;;  %v3225_v41 = vsel %vm3161_vm13, %v3091_v29, %v3193_v17  ;;  %v4270_v29 = vld [vmem:[%s4390_s28 + $0xc0] sm:$0xff]  ;;  %v4272_v17 = vld [vmem:[%s4390_s28 + $0xc8] sm:$0xff] }
 0x314   : > { %3288 = vst [vmem:[%s5451_s19 + $0x90] sm:$0xff] %v3256_v26  ;;  %v3257_v32 = vadd.f32 %v4263_v7, %v3225_v41  ;;  %v3223_v15 = vsel %vm3159_vm15, %v3083_v37, %v3191_v13  ;;  %v4131_v23 = vpop.f32.mrb[148].mxu1 }
 0x315   : > { %3286 = vst [vmem:[%s5451_s19 + $0x80] sm:$0xff] %v3254_v33  ;;  %v3255_v40 = vadd.f32 %v4264_v55, %v3223_v15  ;;  %v3104_v0 = vadd.f32 %v4131_v23, %v5415_v4  ;;  %v3095_v6 = vpop.f32.mrb[149].mxu1 }
 0x316   : > { %3289 = vst [vmem:[%s5451_s19 + $0x98] sm:$0xff] %v3257_v32  ;;  %v3096_v31 = vadd.f32 %v3095_v6, %v5409_v30  ;;  %v4132_v52 = vpop.f32.mrb[150].mxu1  ;;  %v4265_v30 = vld [vmem:[%s4390_s28 + $0xb0] sm:$0xff] }
 0x317   : > { %3287 = vst [vmem:[%s5451_s19 + $0x88] sm:$0xff] %v3255_v40  ;;  %vm3164_vm0 = vcmp.ge.f32.partialorder %v3104_v0, 0.0  ;;  %v3196_v35 = vmul.f32 0.1, %v3104_v0  ;;  %v3107_v56 = vadd.f32 %v4132_v52, %v5417_v61  ;;  %v3098_v39 = vpop.f32.mrb[151].mxu1  ;;  %v4275_v52 = vld [vmem:[%s4390_s28 + $0xf8] sm:$0xff] }
 0x318   : > { %vm3162_vm1 = vcmp.ge.f32.partialorder %v3096_v31, 0.0  ;;  %v3194_v58 = vmul.f32 0.1, %v3096_v31  ;;  %v3099_v43 = vadd.f32 %v3098_v39, %v5411_v9 }
 0x319   : > { %v3228_v4 = vsel %vm3164_vm0, %v3104_v0, %v3196_v35  ;;  %vm3165_vm2 = vcmp.ge.f32.partialorder %v3107_v56, 0.0  ;;  %v3197_v44 = vmul.f32 0.1, %v3107_v56 }
 0x31a   : > { %v3260_v21 = vadd.f32 %v4265_v30, %v3228_v4  ;;  %v3226_v20 = vsel %vm3162_vm1, %v3096_v31, %v3194_v58  ;;  %vm3163_vm3 = vcmp.ge.f32.partialorder %v3099_v43, 0.0  ;;  %v3195_v49 = vmul.f32 0.1, %v3099_v43 }
 0x31b   : > { %v3258_v61 = vadd.f32 %v4266_v48, %v3226_v20  ;;  %v3229_v63 = vsel %vm3165_vm2, %v3107_v56, %v3197_v44 }
 0x31c   : > { %3292 = vst [vmem:[%s5451_s19 + $0xb0] sm:$0xff] %v3260_v21  ;;  %v3261_v18 = vadd.f32 %v4267_v10, %v3229_v63  ;;  %v3227_v24 = vsel %vm3163_vm3, %v3099_v43, %v3195_v49  ;;  %v4135_v9 = vpop.f32.mrb[152].mxu1 }
 0x31d   : > { %3290 = vst [vmem:[%s5451_s19 + $0xa0] sm:$0xff] %v3258_v61  ;;  %v3259_v50 = vadd.f32 %v4268_v16, %v3227_v24  ;;  %v3120_v11 = vadd.f32 %v4135_v9, %v5427_v25  ;;  %v3111_v27 = vpop.f32.mrb[153].mxu1 }
 0x31e   : > { %3293 = vst [vmem:[%s5451_s19 + $0xb8] sm:$0xff] %v3261_v18  ;;  %v3112_v53 = vadd.f32 %v3111_v27, %v5421_v47  ;;  %v4136_v36 = vpop.f32.mrb[154].mxu1  ;;  %v4269_v47 = vld [vmem:[%s4390_s28 + $0xd0] sm:$0xff] }
 0x31f   : > { %3291 = vst [vmem:[%s5451_s19 + $0xa8] sm:$0xff] %v3259_v50  ;;  %vm3168_vm4 = vcmp.ge.f32.partialorder %v3120_v11, 0.0  ;;  %v3200_v19 = vmul.f32 0.1, %v3120_v11  ;;  %v3123_v42 = vadd.f32 %v4136_v36, %v5429_v46  ;;  %v3114_v8 = vpop.f32.mrb[155].mxu1 }
 0x320   : > { %vm3166_vm5 = vcmp.ge.f32.partialorder %v3112_v53, 0.0  ;;  %v3198_v22 = vmul.f32 0.1, %v3112_v53  ;;  %v3115_v62 = vadd.f32 %v3114_v8, %v5423_v45 }
 0x321   : > { %v3232_v25 = vsel %vm3168_vm4, %v3120_v11, %v3200_v19  ;;  %vm3169_vm6 = vcmp.ge.f32.partialorder %v3123_v42, 0.0  ;;  %v3201_v59 = vmul.f32 0.1, %v3123_v42 }
 0x322   : > { %v3264_v1 = vadd.f32 %v4269_v47, %v3232_v25  ;;  %v3230_v54 = vsel %vm3166_vm5, %v3112_v53, %v3198_v22  ;;  %vm3167_vm8 = vcmp.ge.f32.partialorder %v3115_v62, 0.0  ;;  %v3199_v3 = vmul.f32 0.1, %v3115_v62 }
 0x323   : > { %v3262_v46 = vadd.f32 %v4270_v29, %v3230_v54  ;;  %v3233_v51 = vsel %vm3169_vm6, %v3123_v42, %v3201_v59 }
 0x324   : > { %3296 = vst [vmem:[%s5451_s19 + $0xd0] sm:$0xff] %v3264_v1  ;;  %v3265_v37 = vadd.f32 %v4271_v28, %v3233_v51  ;;  %v3231_v14 = vsel %vm3167_vm8, %v3115_v62, %v3199_v3  ;;  %v4139_v45 = vpop.f32.mrb[156].mxu1 }
 0x325   : > { %3294 = vst [vmem:[%s5451_s19 + $0xc0] sm:$0xff] %v3262_v46  ;;  %v3263_v38 = vadd.f32 %v4272_v17, %v3231_v14  ;;  %v3136_v26 = vadd.f32 %v4139_v45, %v5439_v2  ;;  %v3127_v12 = vpop.f32.mrb[157].mxu1 }
 0x326   : > { %3297 = vst [vmem:[%s5451_s19 + $0xd8] sm:$0xff] %v3265_v37  ;;  %v3128_v13 = vadd.f32 %v3127_v12, %v5433_v60  ;;  %v4140_v57 = vpop.f32.mrb[158].mxu1  ;;  %v4273_v60 = vld [vmem:[%s4390_s28 + $0xf0] sm:$0xff] }
 0x327   : > { %3295 = vst [vmem:[%s5451_s19 + $0xc8] sm:$0xff] %v3263_v38  ;;  %vm3172_vm9 = vcmp.ge.f32.partialorder %v3136_v26, 0.0  ;;  %v3204_v33 = vmul.f32 0.1, %v3136_v26  ;;  %v3139_v41 = vadd.f32 %v4140_v57, %v5441_v34  ;;  %v3130_v7 = vpop.f32.mrb[159].mxu1  ;;  %v4274_v34 = vld [vmem:[%s4390_s28 + $0xe0] sm:$0xff] }
 0x328   : > { %vm3170_vm11 = vcmp.ge.f32.partialorder %v3128_v13, 0.0  ;;  %v3202_v32 = vmul.f32 0.1, %v3128_v13  ;;  %v3131_v15 = vadd.f32 %v3130_v7, %v5435_v5  ;;  %v4276_v5 = vld [vmem:[%s4390_s28 + $0xe8] sm:$0xff] }
 0x329   : > { %v3236_v2 = vsel %vm3172_vm9, %v3136_v26, %v3204_v33  ;;  %vm3173_vm12 = vcmp.ge.f32.partialorder %v3139_v41, 0.0  ;;  %v3205_v23 = vmul.f32 0.1, %v3139_v41 }
 0x32a   : > { %v3268_v55 = vadd.f32 %v4273_v60, %v3236_v2  ;;  %v3234_v40 = vsel %vm3170_vm11, %v3128_v13, %v3202_v32  ;;  %vm3171_vm14 = vcmp.ge.f32.partialorder %v3131_v15, 0.0  ;;  %v3203_v0 = vmul.f32 0.1, %v3131_v15 }
 0x32b   : > { %v3266_v6 = vadd.f32 %v4274_v34, %v3234_v40  ;;  %v3237_v31 = vsel %vm3173_vm12, %v3139_v41, %v3205_v23 }
 0x32c   : > { %3300 = vst [vmem:[%s5451_s19 + $0xf0] sm:$0xff] %v3268_v55  ;;  %v3269_v35 = vadd.f32 %v4275_v52, %v3237_v31  ;;  %v3235_v56 = vsel %vm3171_vm14, %v3131_v15, %v3203_v0 }
 0x32d   : > { %3298 = vst [vmem:[%s5451_s19 + $0xe0] sm:$0xff] %v3266_v6  ;;  %v3267_v39 = vadd.f32 %v4276_v5, %v3235_v56 }
 0x32e   : > { %3301 = vst [vmem:[%s5451_s19 + $0xf8] sm:$0xff] %v3269_v35 }
 0x32f   : > { %3299 = vst [vmem:[%s5451_s19 + $0xe8] sm:$0xff] %v3267_v39 }
 0x330 PF: > { %s17_s26 = sadd.s32 1, %s4299_s26   ;;  %s5564_s24 = smov %s4295_s25 }
 0x331   : > { %p14_p5 = scmp.ge.s32.totalorder %s17_s26, 4   ;;  %s5565_s25 = smov %s5567_s27 }
 0x333   :  { %16 = sbr.rel (!%p14_p5) target bundleno = 2 (0x2), region = 84 }

</bundles_post_ra>
